<compile_context>
chip_gen: v5e
topology: v5e:2x2
jax: 0.10.0
libtpu: 0.0.40
codegen_flags: <defaults>
</compile_context>

<pallas_src>
import functools

import jax
import jax.numpy as jnp
from jax.experimental import pallas as pl
from jax.experimental.pallas import tpu as pltpu  # noqa: F401  (TPU backend)

EPS = 1e-6  # LayerNorm eps (partial(nn.LayerNorm, eps=1e-06))


# --------------------------------------------------------------------------
# Kernel
# --------------------------------------------------------------------------
def _layernorm(x, gamma, beta):
    mu = jnp.mean(x, axis=-1, keepdims=True)
    var = jnp.mean(jnp.square(x - mu), axis=-1, keepdims=True)
    return (x - mu) * jax.lax.rsqrt(var + EPS) * gamma + beta


def fused_encoder_kernel(x_ref, pos_ref, wqkv_ref, wo_ref, w1_ref, w2_ref,
                         vecs_ref, out_ref, *, num_heads, num_layers, batch):
    """Whole SmyrfEncoder, whole batch.  x/out: (S*B, D) row-major (s, b)."""
    N, D = x_ref.shape
    H = num_heads
    hd = D // H
    B = batch
    mlp = w1_ref.shape[2]

    # Batch block-mask for attention (row r <-> batch r % B).  Built once,
    # hoisted out of the layer loop.
    row = jax.lax.broadcasted_iota(jnp.int32, (N, N), 0)
    col = jax.lax.broadcasted_iota(jnp.int32, (N, N), 1)
    same_batch = (row % B) == (col % B)                      # (N, N) bool

    # pos-embedding add fused in; dropout = identity (eval).
    x = x_ref[...] + pos_ref[...]                            # (N, D)

    for li in range(num_layers):                             # static unroll (L=2)
        vec = vecs_ref[li]                                   # (8, 128)
        ln1g, ln1b = vec[0:1, 0:D], vec[1:2, 0:D]
        ln2g, ln2b = vec[2:3, 0:D], vec[3:4, 0:D]
        bo = vec[4:5, 0:D]
        b2 = vec[5:6, 0:D]
        b1 = vec[6:7, 0:mlp]
        bqkv = vec[7:8, 0:3 * D]

        # ---- ln_1 ----
        h = _layernorm(x, ln1g, ln1b)

        # ---- self-attention (exact dense softmax, per-batch via mask) ----
        # Packed in-projection; weight pre-transposed to (D, 3D), 1/sqrt(hd)
        # folded into the Q columns and Q bias at prep time.
        qkv = jnp.dot(h, wqkv_ref[li],
                      preferred_element_type=jnp.float32) + bqkv       # (N, 3D)

        # Head-batched (H, N, hd) layout via leading-axis stacking.
        q = jnp.stack([qkv[:, i * hd:(i + 1) * hd] for i in range(H)], axis=0)
        k = jnp.stack([qkv[:, D + i * hd:D + (i + 1) * hd] for i in range(H)], axis=0)
        v = jnp.stack([qkv[:, 2 * D + i * hd:2 * D + (i + 1) * hd] for i in range(H)], axis=0)

        s = jnp.einsum('hie,hje->hij', q, k,
                       preferred_element_type=jnp.float32)             # (H, N, N)
        s = jnp.where(same_batch[None, :, :], s, -1e30)                # block mask
        m = jnp.max(s, axis=-1, keepdims=True)
        p = jnp.exp(s - m)
        p = p * pl.reciprocal(jnp.sum(p, axis=-1, keepdims=True), approx=True)
        ctx = jnp.einsum('hij,hje->hie', p, v,
                         preferred_element_type=jnp.float32)           # (H, N, hd)

        # Out-projection with per-head weight slabs (H, hd, D); sum over the
        # leading head axis (no lane-axis concatenate).
        attn = jnp.einsum('hie,heo->hio', ctx, wo_ref[li],
                          preferred_element_type=jnp.float32).sum(axis=0) + bo
        x = attn + x                                                   # residual 1

        # ---- ln_2 + MLP (Linear -> GELU(tanh) -> Linear) ----
        y = _layernorm(x, ln2g, ln2b)
        y = jnp.dot(y, w1_ref[li], preferred_element_type=jnp.float32) + b1
        y = jax.nn.gelu(y, approximate=True)        # tanh -> EUP (vs torch erf)
        y = jnp.dot(y, w2_ref[li], preferred_element_type=jnp.float32) + b2
        x = x + y                                                      # residual 2

    # ---- final LayerNorm (self.ln), stored in the last vecs slot ----
    fin = vecs_ref[num_layers]
    out_ref[...] = _layernorm(x, fin[0:1, 0:D], fin[1:2, 0:D]).astype(out_ref.dtype)


# --------------------------------------------------------------------------
# Wrapper / parameter packing
# --------------------------------------------------------------------------
def prepare_fused_params(params, num_heads, batch):
    """Stack per-layer params on a leading layer axis, pre-transpose weights,
    fold 1/sqrt(head_dim) into Q, and pack all 1-D params into one slab."""
    layers = params["layers"]
    D = params["ln_g"].shape[0]
    mlp = layers[0]["mlp_b1"].shape[0]
    H = num_heads
    hd = D // H
    scale = 1.0 / jnp.sqrt(jnp.float32(hd))

    qkv_scale = jnp.concatenate([jnp.full((D,), scale, jnp.float32),
                                 jnp.ones((2 * D,), jnp.float32)])
    wqkv = jnp.stack([lp["in_proj_w"].T for lp in layers]) * qkv_scale   # (L, D, 3D)
    wo = jnp.stack([lp["out_proj_w"].T.reshape(H, hd, D)
                    for lp in layers])                                   # (L, H, hd, D)
    w1 = jnp.stack([lp["mlp_w1"].T for lp in layers])                    # (L, D, mlp)
    w2 = jnp.stack([lp["mlp_w2"].T for lp in layers])                    # (L, mlp, D)

    # One (L+1, 8, vec_w) slab holding every 1-D parameter (rows lane-padded).
    vec_w = ((max(3 * D, mlp, D) + 127) // 128) * 128
    pad = lambda a: jnp.pad(a.astype(jnp.float32), (0, vec_w - a.shape[0]))
    vec_rows = []
    for lp in layers:
        vec_rows.append(jnp.stack([
            pad(lp["ln1_g"]), pad(lp["ln1_b"]),
            pad(lp["ln2_g"]), pad(lp["ln2_b"]),
            pad(lp["out_proj_b"]), pad(lp["mlp_b2"]),
            pad(lp["mlp_b1"]), pad(lp["in_proj_b"] * qkv_scale)]))
    fin = jnp.stack([pad(params["ln_g"]), pad(params["ln_b"])]
                    + [jnp.zeros((vec_w,), jnp.float32)] * 6)
    vecs = jnp.stack(vec_rows + [fin])                                   # (L+1, 8, vec_w)

    pos = jnp.repeat(params["pos_embedding"][:, 0, :], batch, axis=0)    # (S*B, D)
    return pos, wqkv, wo, w1, w2, vecs


def smyrf_encoder_forward(x_sbd, params, num_heads):
    """x_sbd: (seq, batch, hidden), exactly like the PyTorch module."""
    S, B, D = x_sbd.shape
    num_layers = len(params["layers"])
    pos, wqkv, wo, w1, w2, vecs = prepare_fused_params(params, num_heads, B)

    # Row-major flatten only (no transpose, no extra HBM round trip).
    x_flat = x_sbd.reshape(S * B, D)

    out = pl.pallas_call(
        functools.partial(fused_encoder_kernel, num_heads=num_heads,
                          num_layers=num_layers, batch=B),
        out_shape=jax.ShapeDtypeStruct((S * B, D), x_sbd.dtype),
    )(x_flat, pos, wqkv, wo, w1, w2, vecs)

    return out.reshape(S, B, D)


# --------------------------------------------------------------------------
# Deterministic parameter construction (synthetic weights, no checkpoint)
# --------------------------------------------------------------------------
def init_params(key, seq_length, num_layers, hidden_dim, mlp_dim):
    keys = jax.random.split(key, 2 + num_layers * 4)
    params = {
        "pos_embedding": 0.02 * jax.random.normal(
            keys[0], (seq_length, 1, hidden_dim), jnp.float32),
        "ln_g": jnp.ones((hidden_dim,), jnp.float32),
        "ln_b": jnp.zeros((hidden_dim,), jnp.float32),
        "layers": [],
    }
    for i in range(num_layers):
        k0, k1, k2, k3 = keys[2 + 4 * i: 2 + 4 * (i + 1)]
        params["layers"].append({
            "ln1_g": jnp.ones((hidden_dim,), jnp.float32),
            "ln1_b": jnp.zeros((hidden_dim,), jnp.float32),
            "in_proj_w": 0.02 * jax.random.normal(
                k0, (3 * hidden_dim, hidden_dim), jnp.float32),
            "in_proj_b": jnp.zeros((3 * hidden_dim,), jnp.float32),
            "out_proj_w": 0.02 * jax.random.normal(
                k1, (hidden_dim, hidden_dim), jnp.float32),
            "out_proj_b": jnp.zeros((hidden_dim,), jnp.float32),
            "ln2_g": jnp.ones((hidden_dim,), jnp.float32),
            "ln2_b": jnp.zeros((hidden_dim,), jnp.float32),
            "mlp_w1": 0.02 * jax.random.normal(
                k2, (mlp_dim, hidden_dim), jnp.float32),
            "mlp_b1": jnp.zeros((mlp_dim,), jnp.float32),
            "mlp_w2": 0.02 * jax.random.normal(
                k3, (hidden_dim, mlp_dim), jnp.float32),
            "mlp_b2": jnp.zeros((hidden_dim,), jnp.float32),
        })
    return params


# --------------------------------------------------------------------------
# Pure-JAX reference (PyTorch eval-mode semantics) for a sanity check
# --------------------------------------------------------------------------
def reference_forward(x_sbd, params, num_heads):
    D = params["ln_g"].shape[0]
    hd = D // num_heads

    def ln(x, g, b):
        mu = x.mean(-1, keepdims=True)
        var = ((x - mu) ** 2).mean(-1, keepdims=True)
        return (x - mu) / jnp.sqrt(var + EPS) * g + b

    x = x_sbd + params["pos_embedding"]                    # (S, B, D)
    x = jnp.transpose(x, (1, 0, 2))                        # (B, S, D)
    B, S, _ = x.shape
    for lp in params["layers"]:
        h = ln(x, lp["ln1_g"], lp["ln1_b"])
        qkv = h @ lp["in_proj_w"].T + lp["in_proj_b"]
        q, k, v = jnp.split(qkv, 3, axis=-1)
        q = q.reshape(B, S, num_heads, hd).transpose(0, 2, 1, 3) / jnp.sqrt(float(hd))
        k = k.reshape(B, S, num_heads, hd).transpose(0, 2, 1, 3)
        v = v.reshape(B, S, num_heads, hd).transpose(0, 2, 1, 3)
        s = q @ jnp.swapaxes(k, -1, -2)
        p = jax.nn.softmax(s, axis=-1)
        ctx = (p @ v).transpose(0, 2, 1, 3).reshape(B, S, D)
        attn = ctx @ lp["out_proj_w"].T + lp["out_proj_b"]
        x2 = attn + x
        y = ln(x2, lp["ln2_g"], lp["ln2_b"])
        y = jax.nn.gelu(y @ lp["mlp_w1"].T + lp["mlp_b1"], approximate=False)
        y = y @ lp["mlp_w2"].T + lp["mlp_b2"]
        x = x2 + y
    x = ln(x, params["ln_g"], params["ln_b"])
    return jnp.transpose(x, (1, 0, 2))


# --------------------------------------------------------------------------
if __name__ == "__main__":
    SEQ_LEN = 8
    BATCH = 2
    HIDDEN = 32
    NUM_HEADS = 4
    MLP_DIM = 64
    NUM_LAYERS = 2   # smyrf_plug_in/out indices only select the block type;
                     # eval-mode math is identical under exact attention.

    key = jax.random.PRNGKey(0)
    k_param, k_x = jax.random.split(key)
    params = init_params(k_param, SEQ_LEN, NUM_LAYERS, HIDDEN, MLP_DIM)
    x = jax.random.normal(k_x, (SEQ_LEN, BATCH, HIDDEN), jnp.float32)

    fwd = jax.jit(functools.partial(smyrf_encoder_forward, num_heads=NUM_HEADS))
    out = jax.block_until_ready(fwd(x, params))
    assert out.shape == (SEQ_LEN, BATCH, HIDDEN), out.shape
    assert jnp.all(jnp.isfinite(out))

    ref = reference_forward(x, params, NUM_HEADS)
    assert jnp.allclose(out, ref, atol=1e-2, rtol=1e-2), (
        "max abs diff vs reference: %f" % float(jnp.max(jnp.abs(out - ref))))

    print("KERNEL_OK")
</pallas_src>

<mosaic_0001>
module attributes {stable_mosaic.version = 11 : i64} {
  func.func @fused_encoder_kernel(%arg0: memref<16x32xf32, #tpu.memory_space<vmem>>, %arg1: memref<16x32xf32, #tpu.memory_space<vmem>>, %arg2: memref<2x32x96xf32, #tpu.memory_space<vmem>>, %arg3: memref<2x4x8x32xf32, #tpu.memory_space<vmem>>, %arg4: memref<2x32x64xf32, #tpu.memory_space<vmem>>, %arg5: memref<2x64x32xf32, #tpu.memory_space<vmem>>, %arg6: memref<3x8x128xf32, #tpu.memory_space<vmem>>, %arg7: memref<16x32xf32, #tpu.memory_space<vmem>>) attributes {dimension_semantics = [], scalar_prefetch = 0 : i64, scratch_operands = 0 : i64, tpu.core_type = #tpu.core_type<tc>} {
    %0 = tpu.iota {dimensions = array<i32: 0>} : vector<16x16xi32>
    %1 = tpu.iota {dimensions = array<i32: 1>} : vector<16x16xi32>
    %c2_i32 = arith.constant 2 : i32
    %c0_i32 = arith.constant 0 : i32
    %2 = arith.cmpi eq, %c2_i32, %c0_i32 : i32
    %c1_i32 = arith.constant 1 : i32
    %3 = arith.select %2, %c1_i32, %c2_i32 : i32
    %4 = vector.broadcast %3 : i32 to vector<16x16xi32>
    %5 = arith.remsi %0, %4 : vector<16x16xi32>
    %c0_i32_0 = arith.constant 0 : i32
    %6 = vector.broadcast %c0_i32_0 : i32 to vector<16x16xi32>
    %7 = arith.cmpi ne, %5, %6 : vector<16x16xi32>
    %c0_i32_1 = arith.constant 0 : i32
    %8 = vector.broadcast %c0_i32_1 : i32 to vector<16x16xi32>
    %9 = arith.cmpi slt, %5, %8 : vector<16x16xi32>
    %c0_i32_2 = arith.constant 0 : i32
    %10 = arith.cmpi slt, %3, %c0_i32_2 : i32
    %11 = vector.broadcast %10 : i1 to vector<16x16xi1>
    %12 = vector.broadcast %11 : vector<16x16xi1> to vector<16x16xi1>
    %13 = arith.xori %9, %12 : vector<16x16xi1>
    %14 = arith.andi %13, %7 : vector<16x16xi1>
    %15 = vector.broadcast %3 : i32 to vector<16x16xi32>
    %16 = arith.addi %5, %15 : vector<16x16xi32>
    %17 = arith.select %14, %16, %5 : vector<16x16xi1>, vector<16x16xi32>
    %c2_i32_3 = arith.constant 2 : i32
    %c0_i32_4 = arith.constant 0 : i32
    %18 = arith.cmpi eq, %c2_i32_3, %c0_i32_4 : i32
    %c1_i32_5 = arith.constant 1 : i32
    %19 = arith.select %18, %c1_i32_5, %c2_i32_3 : i32
    %20 = vector.broadcast %19 : i32 to vector<16x16xi32>
    %21 = arith.remsi %1, %20 : vector<16x16xi32>
    %c0_i32_6 = arith.constant 0 : i32
    %22 = vector.broadcast %c0_i32_6 : i32 to vector<16x16xi32>
    %23 = arith.cmpi ne, %21, %22 : vector<16x16xi32>
    %c0_i32_7 = arith.constant 0 : i32
    %24 = vector.broadcast %c0_i32_7 : i32 to vector<16x16xi32>
    %25 = arith.cmpi slt, %21, %24 : vector<16x16xi32>
    %c0_i32_8 = arith.constant 0 : i32
    %26 = arith.cmpi slt, %19, %c0_i32_8 : i32
    %27 = vector.broadcast %26 : i1 to vector<16x16xi1>
    %28 = vector.broadcast %27 : vector<16x16xi1> to vector<16x16xi1>
    %29 = arith.xori %25, %28 : vector<16x16xi1>
    %30 = arith.andi %29, %23 : vector<16x16xi1>
    %31 = vector.broadcast %19 : i32 to vector<16x16xi32>
    %32 = arith.addi %21, %31 : vector<16x16xi32>
    %33 = arith.select %30, %32, %21 : vector<16x16xi1>, vector<16x16xi32>
    %34 = arith.cmpi eq, %17, %33 : vector<16x16xi32>
    %c0 = arith.constant 0 : index
    %c0_9 = arith.constant 0 : index
    %35 = vector.load %arg0[%c0, %c0_9] : memref<16x32xf32, #tpu.memory_space<vmem>>, vector<16x32xf32>
    %c0_10 = arith.constant 0 : index
    %c0_11 = arith.constant 0 : index
    %36 = vector.load %arg1[%c0_10, %c0_11] : memref<16x32xf32, #tpu.memory_space<vmem>>, vector<16x32xf32>
    %37 = arith.addf %35, %36 : vector<16x32xf32>
    %c0_12 = arith.constant 0 : index
    %c0_13 = arith.constant 0 : index
    %c0_14 = arith.constant 0 : index
    %38 = vector.load %arg6[%c0_12, %c0_13, %c0_14] : memref<3x8x128xf32, #tpu.memory_space<vmem>>, vector<1x8x128xf32>
    %39 = vector.shape_cast %38 : vector<1x8x128xf32> to vector<8x128xf32>
    %40 = vector.extract_strided_slice %39 {offsets = [0, 0], sizes = [1, 32], strides = [1, 1]} : vector<8x128xf32> to vector<1x32xf32>
    %41 = vector.extract_strided_slice %39 {offsets = [1, 0], sizes = [1, 32], strides = [1, 1]} : vector<8x128xf32> to vector<1x32xf32>
    %42 = vector.extract_strided_slice %39 {offsets = [2, 0], sizes = [1, 32], strides = [1, 1]} : vector<8x128xf32> to vector<1x32xf32>
    %43 = vector.extract_strided_slice %39 {offsets = [3, 0], sizes = [1, 32], strides = [1, 1]} : vector<8x128xf32> to vector<1x32xf32>
    %44 = vector.extract_strided_slice %39 {offsets = [4, 0], sizes = [1, 32], strides = [1, 1]} : vector<8x128xf32> to vector<1x32xf32>
    %45 = vector.extract_strided_slice %39 {offsets = [5, 0], sizes = [1, 32], strides = [1, 1]} : vector<8x128xf32> to vector<1x32xf32>
    %46 = vector.extract_strided_slice %39 {offsets = [6, 0], sizes = [1, 64], strides = [1, 1]} : vector<8x128xf32> to vector<1x64xf32>
    %47 = vector.extract_strided_slice %39 {offsets = [7, 0], sizes = [1, 96], strides = [1, 1]} : vector<8x128xf32> to vector<1x96xf32>
    %cst = arith.constant dense<0.000000e+00> : vector<16xf32>
    %48 = vector.multi_reduction <add>, %37, %cst [1] : vector<16x32xf32> to vector<16xf32>
    %49 = vector.shape_cast %48 : vector<16xf32> to vector<16x1xf32>
    %cst_15 = arith.constant 3.200000e+01 : f32
    %50 = vector.broadcast %cst_15 : f32 to vector<16x1xf32>
    %51 = arith.divf %49, %50 : vector<16x1xf32>
    %52 = vector.broadcast %51 : vector<16x1xf32> to vector<16x32xf32>
    %53 = arith.subf %37, %52 : vector<16x32xf32>
    %54 = arith.mulf %53, %53 : vector<16x32xf32>
    %cst_16 = arith.constant dense<0.000000e+00> : vector<16xf32>
    %55 = vector.multi_reduction <add>, %54, %cst_16 [1] : vector<16x32xf32> to vector<16xf32>
    %56 = vector.shape_cast %55 : vector<16xf32> to vector<16x1xf32>
    %cst_17 = arith.constant 3.200000e+01 : f32
    %57 = vector.broadcast %cst_17 : f32 to vector<16x1xf32>
    %58 = arith.divf %56, %57 : vector<16x1xf32>
    %59 = vector.broadcast %51 : vector<16x1xf32> to vector<16x32xf32>
    %60 = arith.subf %37, %59 : vector<16x32xf32>
    %cst_18 = arith.constant 9.99999997E-7 : f32
    %61 = vector.broadcast %cst_18 : f32 to vector<16x1xf32>
    %62 = arith.addf %58, %61 : vector<16x1xf32>
    %63 = math.rsqrt %62 : vector<16x1xf32>
    %64 = vector.broadcast %63 : vector<16x1xf32> to vector<16x32xf32>
    %65 = arith.mulf %60, %64 : vector<16x32xf32>
    %66 = vector.broadcast %40 : vector<1x32xf32> to vector<16x32xf32>
    %67 = arith.mulf %65, %66 : vector<16x32xf32>
    %68 = vector.broadcast %41 : vector<1x32xf32> to vector<16x32xf32>
    %69 = arith.addf %67, %68 : vector<16x32xf32>
    %c0_19 = arith.constant 0 : index
    %c0_20 = arith.constant 0 : index
    %c0_21 = arith.constant 0 : index
    %70 = vector.load %arg2[%c0_19, %c0_20, %c0_21] : memref<2x32x96xf32, #tpu.memory_space<vmem>>, vector<1x32x96xf32>
    %71 = vector.shape_cast %70 : vector<1x32x96xf32> to vector<32x96xf32>
    %cst_22 = arith.constant dense<0.000000e+00> : vector<16x96xf32>
    %72 = tpu.matmul %69, %71, %cst_22 {dimension_numbers = #tpu.dot_dimension_numbers<[1], [0], [0], [1], [0, 0, 1, 1], [], []>} : vector<16x32xf32>, vector<32x96xf32>, vector<16x96xf32> -> vector<16x96xf32>
    %73 = vector.broadcast %47 : vector<1x96xf32> to vector<16x96xf32>
    %74 = arith.addf %72, %73 : vector<16x96xf32>
    %75 = vector.extract_strided_slice %74 {offsets = [0, 0], sizes = [16, 8], strides = [1, 1]} : vector<16x96xf32> to vector<16x8xf32>
    %76 = vector.extract_strided_slice %74 {offsets = [0, 8], sizes = [16, 8], strides = [1, 1]} : vector<16x96xf32> to vector<16x8xf32>
    %77 = vector.extract_strided_slice %74 {offsets = [0, 16], sizes = [16, 8], strides = [1, 1]} : vector<16x96xf32> to vector<16x8xf32>
    %78 = vector.extract_strided_slice %74 {offsets = [0, 24], sizes = [16, 8], strides = [1, 1]} : vector<16x96xf32> to vector<16x8xf32>
    %79 = vector.shape_cast %75 : vector<16x8xf32> to vector<1x16x8xf32>
    %80 = vector.shape_cast %76 : vector<16x8xf32> to vector<1x16x8xf32>
    %81 = vector.shape_cast %77 : vector<16x8xf32> to vector<1x16x8xf32>
    %82 = vector.shape_cast %78 : vector<16x8xf32> to vector<1x16x8xf32>
    %83 = tpu.concatenate %79, %80, %81, %82 in 0 : vector<1x16x8xf32>, vector<1x16x8xf32>, vector<1x16x8xf32>, vector<1x16x8xf32> -> vector<4x16x8xf32>
    %84 = vector.extract_strided_slice %74 {offsets = [0, 32], sizes = [16, 8], strides = [1, 1]} : vector<16x96xf32> to vector<16x8xf32>
    %85 = vector.extract_strided_slice %74 {offsets = [0, 40], sizes = [16, 8], strides = [1, 1]} : vector<16x96xf32> to vector<16x8xf32>
    %86 = vector.extract_strided_slice %74 {offsets = [0, 48], sizes = [16, 8], strides = [1, 1]} : vector<16x96xf32> to vector<16x8xf32>
    %87 = vector.extract_strided_slice %74 {offsets = [0, 56], sizes = [16, 8], strides = [1, 1]} : vector<16x96xf32> to vector<16x8xf32>
    %88 = vector.shape_cast %84 : vector<16x8xf32> to vector<1x16x8xf32>
    %89 = vector.shape_cast %85 : vector<16x8xf32> to vector<1x16x8xf32>
    %90 = vector.shape_cast %86 : vector<16x8xf32> to vector<1x16x8xf32>
    %91 = vector.shape_cast %87 : vector<16x8xf32> to vector<1x16x8xf32>
    %92 = tpu.concatenate %88, %89, %90, %91 in 0 : vector<1x16x8xf32>, vector<1x16x8xf32>, vector<1x16x8xf32>, vector<1x16x8xf32> -> vector<4x16x8xf32>
    %93 = vector.extract_strided_slice %74 {offsets = [0, 64], sizes = [16, 8], strides = [1, 1]} : vector<16x96xf32> to vector<16x8xf32>
    %94 = vector.extract_strided_slice %74 {offsets = [0, 72], sizes = [16, 8], strides = [1, 1]} : vector<16x96xf32> to vector<16x8xf32>
    %95 = vector.extract_strided_slice %74 {offsets = [0, 80], sizes = [16, 8], strides = [1, 1]} : vector<16x96xf32> to vector<16x8xf32>
    %96 = vector.extract_strided_slice %74 {offsets = [0, 88], sizes = [16, 8], strides = [1, 1]} : vector<16x96xf32> to vector<16x8xf32>
    %97 = vector.shape_cast %93 : vector<16x8xf32> to vector<1x16x8xf32>
    %98 = vector.shape_cast %94 : vector<16x8xf32> to vector<1x16x8xf32>
    %99 = vector.shape_cast %95 : vector<16x8xf32> to vector<1x16x8xf32>
    %100 = vector.shape_cast %96 : vector<16x8xf32> to vector<1x16x8xf32>
    %101 = tpu.concatenate %97, %98, %99, %100 in 0 : vector<1x16x8xf32>, vector<1x16x8xf32>, vector<1x16x8xf32>, vector<1x16x8xf32> -> vector<4x16x8xf32>
    "tpu.trace_start"() <{level = 10 : i32, message = "hie,hje->hij"}> : () -> ()
    %cst_23 = arith.constant dense<0.000000e+00> : vector<4x16x16xf32>
    %102 = tpu.matmul %83, %92, %cst_23 {dimension_numbers = #tpu.dot_dimension_numbers<[2], [2], [1], [1], [0, 0, 0, 1, 1, 1], [0], [0]>} : vector<4x16x8xf32>, vector<4x16x8xf32>, vector<4x16x16xf32> -> vector<4x16x16xf32>
    "tpu.trace_stop"() : () -> ()
    %103 = vector.shape_cast %34 : vector<16x16xi1> to vector<1x16x16xi1>
    %cst_24 = arith.constant -1.000000e+30 : f32
    %104 = vector.shape_cast %103 : vector<1x16x16xi1> to vector<1x16x16xi1>
    %105 = vector.broadcast %104 : vector<1x16x16xi1> to vector<4x16x16xi1>
    %106 = vector.broadcast %cst_24 : f32 to vector<4x16x16xf32>
    %107 = arith.select %105, %102, %106 : vector<4x16x16xi1>, vector<4x16x16xf32>
    %cst_25 = arith.constant dense<0xFF800000> : vector<4x16xf32>
    %108 = vector.multi_reduction <maximumf>, %107, %cst_25 [2] : vector<4x16x16xf32> to vector<4x16xf32>
    %109 = vector.shape_cast %108 : vector<4x16xf32> to vector<4x16x1xf32>
    %110 = vector.broadcast %109 : vector<4x16x1xf32> to vector<4x16x16xf32>
    %111 = arith.subf %107, %110 : vector<4x16x16xf32>
    %112 = math.exp %111 : vector<4x16x16xf32>
    %cst_26 = arith.constant dense<0.000000e+00> : vector<4x16xf32>
    %113 = vector.multi_reduction <add>, %112, %cst_26 [2] : vector<4x16x16xf32> to vector<4x16xf32>
    %114 = vector.shape_cast %113 : vector<4x16xf32> to vector<4x16x1xf32>
    %115 = tpu.reciprocal %114 {approx = true} : vector<4x16x1xf32> -> vector<4x16x1xf32>
    %116 = vector.broadcast %115 : vector<4x16x1xf32> to vector<4x16x16xf32>
    %117 = arith.mulf %112, %116 : vector<4x16x16xf32>
    "tpu.trace_start"() <{level = 10 : i32, message = "hij,hje->hie"}> : () -> ()
    %cst_27 = arith.constant dense<0.000000e+00> : vector<4x16x8xf32>
    %118 = tpu.matmul %117, %101, %cst_27 {dimension_numbers = #tpu.dot_dimension_numbers<[2], [1], [1], [2], [0, 0, 0, 1, 1, 2], [0], [0]>} : vector<4x16x16xf32>, vector<4x16x8xf32>, vector<4x16x8xf32> -> vector<4x16x8xf32>
    "tpu.trace_stop"() : () -> ()
    %c0_28 = arith.constant 0 : index
    %c0_29 = arith.constant 0 : index
    %c0_30 = arith.constant 0 : index
    %c0_31 = arith.constant 0 : index
    %119 = vector.load %arg3[%c0_28, %c0_29, %c0_30, %c0_31] : memref<2x4x8x32xf32, #tpu.memory_space<vmem>>, vector<1x4x8x32xf32>
    %120 = vector.shape_cast %119 : vector<1x4x8x32xf32> to vector<4x8x32xf32>
    "tpu.trace_start"() <{level = 10 : i32, message = "hie,heo->hio"}> : () -> ()
    %cst_32 = arith.constant dense<0.000000e+00> : vector<4x16x32xf32>
    %121 = tpu.matmul %118, %120, %cst_32 {dimension_numbers = #tpu.dot_dimension_numbers<[2], [1], [1], [2], [0, 0, 0, 1, 1, 2], [0], [0]>} : vector<4x16x8xf32>, vector<4x8x32xf32>, vector<4x16x32xf32> -> vector<4x16x32xf32>
    "tpu.trace_stop"() : () -> ()
    %cst_33 = arith.constant dense<0.000000e+00> : vector<16x32xf32>
    %122 = vector.multi_reduction <add>, %121, %cst_33 [0] : vector<4x16x32xf32> to vector<16x32xf32>
    %123 = vector.broadcast %44 : vector<1x32xf32> to vector<16x32xf32>
    %124 = arith.addf %122, %123 : vector<16x32xf32>
    %125 = arith.addf %124, %37 : vector<16x32xf32>
    %cst_34 = arith.constant dense<0.000000e+00> : vector<16xf32>
    %126 = vector.multi_reduction <add>, %125, %cst_34 [1] : vector<16x32xf32> to vector<16xf32>
    %127 = vector.shape_cast %126 : vector<16xf32> to vector<16x1xf32>
    %cst_35 = arith.constant 3.200000e+01 : f32
    %128 = vector.broadcast %cst_35 : f32 to vector<16x1xf32>
    %129 = arith.divf %127, %128 : vector<16x1xf32>
    %130 = vector.broadcast %129 : vector<16x1xf32> to vector<16x32xf32>
    %131 = arith.subf %125, %130 : vector<16x32xf32>
    %132 = arith.mulf %131, %131 : vector<16x32xf32>
    %cst_36 = arith.constant dense<0.000000e+00> : vector<16xf32>
    %133 = vector.multi_reduction <add>, %132, %cst_36 [1] : vector<16x32xf32> to vector<16xf32>
    %134 = vector.shape_cast %133 : vector<16xf32> to vector<16x1xf32>
    %cst_37 = arith.constant 3.200000e+01 : f32
    %135 = vector.broadcast %cst_37 : f32 to vector<16x1xf32>
    %136 = arith.divf %134, %135 : vector<16x1xf32>
    %137 = vector.broadcast %129 : vector<16x1xf32> to vector<16x32xf32>
    %138 = arith.subf %125, %137 : vector<16x32xf32>
    %cst_38 = arith.constant 9.99999997E-7 : f32
    %139 = vector.broadcast %cst_38 : f32 to vector<16x1xf32>
    %140 = arith.addf %136, %139 : vector<16x1xf32>
    %141 = math.rsqrt %140 : vector<16x1xf32>
    %142 = vector.broadcast %141 : vector<16x1xf32> to vector<16x32xf32>
    %143 = arith.mulf %138, %142 : vector<16x32xf32>
    %144 = vector.broadcast %42 : vector<1x32xf32> to vector<16x32xf32>
    %145 = arith.mulf %143, %144 : vector<16x32xf32>
    %146 = vector.broadcast %43 : vector<1x32xf32> to vector<16x32xf32>
    %147 = arith.addf %145, %146 : vector<16x32xf32>
    %c0_39 = arith.constant 0 : index
    %c0_40 = arith.constant 0 : index
    %c0_41 = arith.constant 0 : index
    %148 = vector.load %arg4[%c0_39, %c0_40, %c0_41] : memref<2x32x64xf32, #tpu.memory_space<vmem>>, vector<1x32x64xf32>
    %149 = vector.shape_cast %148 : vector<1x32x64xf32> to vector<32x64xf32>
    %cst_42 = arith.constant dense<0.000000e+00> : vector<16x64xf32>
    %150 = tpu.matmul %147, %149, %cst_42 {dimension_numbers = #tpu.dot_dimension_numbers<[1], [0], [0], [1], [0, 0, 1, 1], [], []>} : vector<16x32xf32>, vector<32x64xf32>, vector<16x64xf32> -> vector<16x64xf32>
    %151 = vector.broadcast %46 : vector<1x64xf32> to vector<16x64xf32>
    %152 = arith.addf %150, %151 : vector<16x64xf32>
    %153 = arith.mulf %152, %152 : vector<16x64xf32>
    %154 = arith.mulf %152, %153 : vector<16x64xf32>
    %cst_43 = arith.constant 4.471500e-02 : f32
    %155 = vector.broadcast %cst_43 : f32 to vector<16x64xf32>
    %156 = arith.mulf %155, %154 : vector<16x64xf32>
    %157 = arith.addf %152, %156 : vector<16x64xf32>
    %cst_44 = arith.constant 0.797884583 : f32
    %158 = vector.broadcast %cst_44 : f32 to vector<16x64xf32>
    %159 = arith.mulf %158, %157 : vector<16x64xf32>
    %160 = math.tanh %159 : vector<16x64xf32>
    %cst_45 = arith.constant 1.000000e+00 : f32
    %161 = vector.broadcast %cst_45 : f32 to vector<16x64xf32>
    %162 = arith.addf %161, %160 : vector<16x64xf32>
    %cst_46 = arith.constant 5.000000e-01 : f32
    %163 = vector.broadcast %cst_46 : f32 to vector<16x64xf32>
    %164 = arith.mulf %163, %162 : vector<16x64xf32>
    %165 = arith.mulf %152, %164 : vector<16x64xf32>
    %c0_47 = arith.constant 0 : index
    %c0_48 = arith.constant 0 : index
    %c0_49 = arith.constant 0 : index
    %166 = vector.load %arg5[%c0_47, %c0_48, %c0_49] : memref<2x64x32xf32, #tpu.memory_space<vmem>>, vector<1x64x32xf32>
    %167 = vector.shape_cast %166 : vector<1x64x32xf32> to vector<64x32xf32>
    %cst_50 = arith.constant dense<0.000000e+00> : vector<16x32xf32>
    %168 = tpu.matmul %165, %167, %cst_50 {dimension_numbers = #tpu.dot_dimension_numbers<[1], [0], [0], [1], [0, 0, 1, 1], [], []>} : vector<16x64xf32>, vector<64x32xf32>, vector<16x32xf32> -> vector<16x32xf32>
    %169 = vector.broadcast %45 : vector<1x32xf32> to vector<16x32xf32>
    %170 = arith.addf %168, %169 : vector<16x32xf32>
    %171 = arith.addf %125, %170 : vector<16x32xf32>
    %c1 = arith.constant 1 : index
    %c0_51 = arith.constant 0 : index
    %c0_52 = arith.constant 0 : index
    %172 = vector.load %arg6[%c1, %c0_51, %c0_52] : memref<3x8x128xf32, #tpu.memory_space<vmem>>, vector<1x8x128xf32>
    %173 = vector.shape_cast %172 : vector<1x8x128xf32> to vector<8x128xf32>
    %174 = vector.extract_strided_slice %173 {offsets = [0, 0], sizes = [1, 32], strides = [1, 1]} : vector<8x128xf32> to vector<1x32xf32>
    %175 = vector.extract_strided_slice %173 {offsets = [1, 0], sizes = [1, 32], strides = [1, 1]} : vector<8x128xf32> to vector<1x32xf32>
    %176 = vector.extract_strided_slice %173 {offsets = [2, 0], sizes = [1, 32], strides = [1, 1]} : vector<8x128xf32> to vector<1x32xf32>
    %177 = vector.extract_strided_slice %173 {offsets = [3, 0], sizes = [1, 32], strides = [1, 1]} : vector<8x128xf32> to vector<1x32xf32>
    %178 = vector.extract_strided_slice %173 {offsets = [4, 0], sizes = [1, 32], strides = [1, 1]} : vector<8x128xf32> to vector<1x32xf32>
    %179 = vector.extract_strided_slice %173 {offsets = [5, 0], sizes = [1, 32], strides = [1, 1]} : vector<8x128xf32> to vector<1x32xf32>
    %180 = vector.extract_strided_slice %173 {offsets = [6, 0], sizes = [1, 64], strides = [1, 1]} : vector<8x128xf32> to vector<1x64xf32>
    %181 = vector.extract_strided_slice %173 {offsets = [7, 0], sizes = [1, 96], strides = [1, 1]} : vector<8x128xf32> to vector<1x96xf32>
    %cst_53 = arith.constant dense<0.000000e+00> : vector<16xf32>
    %182 = vector.multi_reduction <add>, %171, %cst_53 [1] : vector<16x32xf32> to vector<16xf32>
    %183 = vector.shape_cast %182 : vector<16xf32> to vector<16x1xf32>
    %cst_54 = arith.constant 3.200000e+01 : f32
    %184 = vector.broadcast %cst_54 : f32 to vector<16x1xf32>
    %185 = arith.divf %183, %184 : vector<16x1xf32>
    %186 = vector.broadcast %185 : vector<16x1xf32> to vector<16x32xf32>
    %187 = arith.subf %171, %186 : vector<16x32xf32>
    %188 = arith.mulf %187, %187 : vector<16x32xf32>
    %cst_55 = arith.constant dense<0.000000e+00> : vector<16xf32>
    %189 = vector.multi_reduction <add>, %188, %cst_55 [1] : vector<16x32xf32> to vector<16xf32>
    %190 = vector.shape_cast %189 : vector<16xf32> to vector<16x1xf32>
    %cst_56 = arith.constant 3.200000e+01 : f32
    %191 = vector.broadcast %cst_56 : f32 to vector<16x1xf32>
    %192 = arith.divf %190, %191 : vector<16x1xf32>
    %193 = vector.broadcast %185 : vector<16x1xf32> to vector<16x32xf32>
    %194 = arith.subf %171, %193 : vector<16x32xf32>
    %cst_57 = arith.constant 9.99999997E-7 : f32
    %195 = vector.broadcast %cst_57 : f32 to vector<16x1xf32>
    %196 = arith.addf %192, %195 : vector<16x1xf32>
    %197 = math.rsqrt %196 : vector<16x1xf32>
    %198 = vector.broadcast %197 : vector<16x1xf32> to vector<16x32xf32>
    %199 = arith.mulf %194, %198 : vector<16x32xf32>
    %200 = vector.broadcast %174 : vector<1x32xf32> to vector<16x32xf32>
    %201 = arith.mulf %199, %200 : vector<16x32xf32>
    %202 = vector.broadcast %175 : vector<1x32xf32> to vector<16x32xf32>
    %203 = arith.addf %201, %202 : vector<16x32xf32>
    %c1_58 = arith.constant 1 : index
    %c0_59 = arith.constant 0 : index
    %c0_60 = arith.constant 0 : index
    %204 = vector.load %arg2[%c1_58, %c0_59, %c0_60] : memref<2x32x96xf32, #tpu.memory_space<vmem>>, vector<1x32x96xf32>
    %205 = vector.shape_cast %204 : vector<1x32x96xf32> to vector<32x96xf32>
    %cst_61 = arith.constant dense<0.000000e+00> : vector<16x96xf32>
    %206 = tpu.matmul %203, %205, %cst_61 {dimension_numbers = #tpu.dot_dimension_numbers<[1], [0], [0], [1], [0, 0, 1, 1], [], []>} : vector<16x32xf32>, vector<32x96xf32>, vector<16x96xf32> -> vector<16x96xf32>
    %207 = vector.broadcast %181 : vector<1x96xf32> to vector<16x96xf32>
    %208 = arith.addf %206, %207 : vector<16x96xf32>
    %209 = vector.extract_strided_slice %208 {offsets = [0, 0], sizes = [16, 8], strides = [1, 1]} : vector<16x96xf32> to vector<16x8xf32>
    %210 = vector.extract_strided_slice %208 {offsets = [0, 8], sizes = [16, 8], strides = [1, 1]} : vector<16x96xf32> to vector<16x8xf32>
    %211 = vector.extract_strided_slice %208 {offsets = [0, 16], sizes = [16, 8], strides = [1, 1]} : vector<16x96xf32> to vector<16x8xf32>
    %212 = vector.extract_strided_slice %208 {offsets = [0, 24], sizes = [16, 8], strides = [1, 1]} : vector<16x96xf32> to vector<16x8xf32>
    %213 = vector.shape_cast %209 : vector<16x8xf32> to vector<1x16x8xf32>
    %214 = vector.shape_cast %210 : vector<16x8xf32> to vector<1x16x8xf32>
    %215 = vector.shape_cast %211 : vector<16x8xf32> to vector<1x16x8xf32>
    %216 = vector.shape_cast %212 : vector<16x8xf32> to vector<1x16x8xf32>
    %217 = tpu.concatenate %213, %214, %215, %216 in 0 : vector<1x16x8xf32>, vector<1x16x8xf32>, vector<1x16x8xf32>, vector<1x16x8xf32> -> vector<4x16x8xf32>
    %218 = vector.extract_strided_slice %208 {offsets = [0, 32], sizes = [16, 8], strides = [1, 1]} : vector<16x96xf32> to vector<16x8xf32>
    %219 = vector.extract_strided_slice %208 {offsets = [0, 40], sizes = [16, 8], strides = [1, 1]} : vector<16x96xf32> to vector<16x8xf32>
    %220 = vector.extract_strided_slice %208 {offsets = [0, 48], sizes = [16, 8], strides = [1, 1]} : vector<16x96xf32> to vector<16x8xf32>
    %221 = vector.extract_strided_slice %208 {offsets = [0, 56], sizes = [16, 8], strides = [1, 1]} : vector<16x96xf32> to vector<16x8xf32>
    %222 = vector.shape_cast %218 : vector<16x8xf32> to vector<1x16x8xf32>
    %223 = vector.shape_cast %219 : vector<16x8xf32> to vector<1x16x8xf32>
    %224 = vector.shape_cast %220 : vector<16x8xf32> to vector<1x16x8xf32>
    %225 = vector.shape_cast %221 : vector<16x8xf32> to vector<1x16x8xf32>
    %226 = tpu.concatenate %222, %223, %224, %225 in 0 : vector<1x16x8xf32>, vector<1x16x8xf32>, vector<1x16x8xf32>, vector<1x16x8xf32> -> vector<4x16x8xf32>
    %227 = vector.extract_strided_slice %208 {offsets = [0, 64], sizes = [16, 8], strides = [1, 1]} : vector<16x96xf32> to vector<16x8xf32>
    %228 = vector.extract_strided_slice %208 {offsets = [0, 72], sizes = [16, 8], strides = [1, 1]} : vector<16x96xf32> to vector<16x8xf32>
    %229 = vector.extract_strided_slice %208 {offsets = [0, 80], sizes = [16, 8], strides = [1, 1]} : vector<16x96xf32> to vector<16x8xf32>
    %230 = vector.extract_strided_slice %208 {offsets = [0, 88], sizes = [16, 8], strides = [1, 1]} : vector<16x96xf32> to vector<16x8xf32>
    %231 = vector.shape_cast %227 : vector<16x8xf32> to vector<1x16x8xf32>
    %232 = vector.shape_cast %228 : vector<16x8xf32> to vector<1x16x8xf32>
    %233 = vector.shape_cast %229 : vector<16x8xf32> to vector<1x16x8xf32>
    %234 = vector.shape_cast %230 : vector<16x8xf32> to vector<1x16x8xf32>
    %235 = tpu.concatenate %231, %232, %233, %234 in 0 : vector<1x16x8xf32>, vector<1x16x8xf32>, vector<1x16x8xf32>, vector<1x16x8xf32> -> vector<4x16x8xf32>
    "tpu.trace_start"() <{level = 10 : i32, message = "hie,hje->hij"}> : () -> ()
    %cst_62 = arith.constant dense<0.000000e+00> : vector<4x16x16xf32>
    %236 = tpu.matmul %217, %226, %cst_62 {dimension_numbers = #tpu.dot_dimension_numbers<[2], [2], [1], [1], [0, 0, 0, 1, 1, 1], [0], [0]>} : vector<4x16x8xf32>, vector<4x16x8xf32>, vector<4x16x16xf32> -> vector<4x16x16xf32>
    "tpu.trace_stop"() : () -> ()
    %237 = vector.shape_cast %34 : vector<16x16xi1> to vector<1x16x16xi1>
    %cst_63 = arith.constant -1.000000e+30 : f32
    %238 = vector.shape_cast %237 : vector<1x16x16xi1> to vector<1x16x16xi1>
    %239 = vector.broadcast %238 : vector<1x16x16xi1> to vector<4x16x16xi1>
    %240 = vector.broadcast %cst_63 : f32 to vector<4x16x16xf32>
    %241 = arith.select %239, %236, %240 : vector<4x16x16xi1>, vector<4x16x16xf32>
    %cst_64 = arith.constant dense<0xFF800000> : vector<4x16xf32>
    %242 = vector.multi_reduction <maximumf>, %241, %cst_64 [2] : vector<4x16x16xf32> to vector<4x16xf32>
    %243 = vector.shape_cast %242 : vector<4x16xf32> to vector<4x16x1xf32>
    %244 = vector.broadcast %243 : vector<4x16x1xf32> to vector<4x16x16xf32>
    %245 = arith.subf %241, %244 : vector<4x16x16xf32>
    %246 = math.exp %245 : vector<4x16x16xf32>
    %cst_65 = arith.constant dense<0.000000e+00> : vector<4x16xf32>
    %247 = vector.multi_reduction <add>, %246, %cst_65 [2] : vector<4x16x16xf32> to vector<4x16xf32>
    %248 = vector.shape_cast %247 : vector<4x16xf32> to vector<4x16x1xf32>
    %249 = tpu.reciprocal %248 {approx = true} : vector<4x16x1xf32> -> vector<4x16x1xf32>
    %250 = vector.broadcast %249 : vector<4x16x1xf32> to vector<4x16x16xf32>
    %251 = arith.mulf %246, %250 : vector<4x16x16xf32>
    "tpu.trace_start"() <{level = 10 : i32, message = "hij,hje->hie"}> : () -> ()
    %cst_66 = arith.constant dense<0.000000e+00> : vector<4x16x8xf32>
    %252 = tpu.matmul %251, %235, %cst_66 {dimension_numbers = #tpu.dot_dimension_numbers<[2], [1], [1], [2], [0, 0, 0, 1, 1, 2], [0], [0]>} : vector<4x16x16xf32>, vector<4x16x8xf32>, vector<4x16x8xf32> -> vector<4x16x8xf32>
    "tpu.trace_stop"() : () -> ()
    %c1_67 = arith.constant 1 : index
    %c0_68 = arith.constant 0 : index
    %c0_69 = arith.constant 0 : index
    %c0_70 = arith.constant 0 : index
    %253 = vector.load %arg3[%c1_67, %c0_68, %c0_69, %c0_70] : memref<2x4x8x32xf32, #tpu.memory_space<vmem>>, vector<1x4x8x32xf32>
    %254 = vector.shape_cast %253 : vector<1x4x8x32xf32> to vector<4x8x32xf32>
    "tpu.trace_start"() <{level = 10 : i32, message = "hie,heo->hio"}> : () -> ()
    %cst_71 = arith.constant dense<0.000000e+00> : vector<4x16x32xf32>
    %255 = tpu.matmul %252, %254, %cst_71 {dimension_numbers = #tpu.dot_dimension_numbers<[2], [1], [1], [2], [0, 0, 0, 1, 1, 2], [0], [0]>} : vector<4x16x8xf32>, vector<4x8x32xf32>, vector<4x16x32xf32> -> vector<4x16x32xf32>
    "tpu.trace_stop"() : () -> ()
    %cst_72 = arith.constant dense<0.000000e+00> : vector<16x32xf32>
    %256 = vector.multi_reduction <add>, %255, %cst_72 [0] : vector<4x16x32xf32> to vector<16x32xf32>
    %257 = vector.broadcast %178 : vector<1x32xf32> to vector<16x32xf32>
    %258 = arith.addf %256, %257 : vector<16x32xf32>
    %259 = arith.addf %258, %171 : vector<16x32xf32>
    %cst_73 = arith.constant dense<0.000000e+00> : vector<16xf32>
    %260 = vector.multi_reduction <add>, %259, %cst_73 [1] : vector<16x32xf32> to vector<16xf32>
    %261 = vector.shape_cast %260 : vector<16xf32> to vector<16x1xf32>
    %cst_74 = arith.constant 3.200000e+01 : f32
    %262 = vector.broadcast %cst_74 : f32 to vector<16x1xf32>
    %263 = arith.divf %261, %262 : vector<16x1xf32>
    %264 = vector.broadcast %263 : vector<16x1xf32> to vector<16x32xf32>
    %265 = arith.subf %259, %264 : vector<16x32xf32>
    %266 = arith.mulf %265, %265 : vector<16x32xf32>
    %cst_75 = arith.constant dense<0.000000e+00> : vector<16xf32>
    %267 = vector.multi_reduction <add>, %266, %cst_75 [1] : vector<16x32xf32> to vector<16xf32>
    %268 = vector.shape_cast %267 : vector<16xf32> to vector<16x1xf32>
    %cst_76 = arith.constant 3.200000e+01 : f32
    %269 = vector.broadcast %cst_76 : f32 to vector<16x1xf32>
    %270 = arith.divf %268, %269 : vector<16x1xf32>
    %271 = vector.broadcast %263 : vector<16x1xf32> to vector<16x32xf32>
    %272 = arith.subf %259, %271 : vector<16x32xf32>
    %cst_77 = arith.constant 9.99999997E-7 : f32
    %273 = vector.broadcast %cst_77 : f32 to vector<16x1xf32>
    %274 = arith.addf %270, %273 : vector<16x1xf32>
    %275 = math.rsqrt %274 : vector<16x1xf32>
    %276 = vector.broadcast %275 : vector<16x1xf32> to vector<16x32xf32>
    %277 = arith.mulf %272, %276 : vector<16x32xf32>
    %278 = vector.broadcast %176 : vector<1x32xf32> to vector<16x32xf32>
    %279 = arith.mulf %277, %278 : vector<16x32xf32>
    %280 = vector.broadcast %177 : vector<1x32xf32> to vector<16x32xf32>
    %281 = arith.addf %279, %280 : vector<16x32xf32>
    %c1_78 = arith.constant 1 : index
    %c0_79 = arith.constant 0 : index
    %c0_80 = arith.constant 0 : index
    %282 = vector.load %arg4[%c1_78, %c0_79, %c0_80] : memref<2x32x64xf32, #tpu.memory_space<vmem>>, vector<1x32x64xf32>
    %283 = vector.shape_cast %282 : vector<1x32x64xf32> to vector<32x64xf32>
    %cst_81 = arith.constant dense<0.000000e+00> : vector<16x64xf32>
    %284 = tpu.matmul %281, %283, %cst_81 {dimension_numbers = #tpu.dot_dimension_numbers<[1], [0], [0], [1], [0, 0, 1, 1], [], []>} : vector<16x32xf32>, vector<32x64xf32>, vector<16x64xf32> -> vector<16x64xf32>
    %285 = vector.broadcast %180 : vector<1x64xf32> to vector<16x64xf32>
    %286 = arith.addf %284, %285 : vector<16x64xf32>
    %287 = arith.mulf %286, %286 : vector<16x64xf32>
    %288 = arith.mulf %286, %287 : vector<16x64xf32>
    %cst_82 = arith.constant 4.471500e-02 : f32
    %289 = vector.broadcast %cst_82 : f32 to vector<16x64xf32>
    %290 = arith.mulf %289, %288 : vector<16x64xf32>
    %291 = arith.addf %286, %290 : vector<16x64xf32>
    %cst_83 = arith.constant 0.797884583 : f32
    %292 = vector.broadcast %cst_83 : f32 to vector<16x64xf32>
    %293 = arith.mulf %292, %291 : vector<16x64xf32>
    %294 = math.tanh %293 : vector<16x64xf32>
    %cst_84 = arith.constant 1.000000e+00 : f32
    %295 = vector.broadcast %cst_84 : f32 to vector<16x64xf32>
    %296 = arith.addf %295, %294 : vector<16x64xf32>
    %cst_85 = arith.constant 5.000000e-01 : f32
    %297 = vector.broadcast %cst_85 : f32 to vector<16x64xf32>
    %298 = arith.mulf %297, %296 : vector<16x64xf32>
    %299 = arith.mulf %286, %298 : vector<16x64xf32>
    %c1_86 = arith.constant 1 : index
    %c0_87 = arith.constant 0 : index
    %c0_88 = arith.constant 0 : index
    %300 = vector.load %arg5[%c1_86, %c0_87, %c0_88] : memref<2x64x32xf32, #tpu.memory_space<vmem>>, vector<1x64x32xf32>
    %301 = vector.shape_cast %300 : vector<1x64x32xf32> to vector<64x32xf32>
    %cst_89 = arith.constant dense<0.000000e+00> : vector<16x32xf32>
    %302 = tpu.matmul %299, %301, %cst_89 {dimension_numbers = #tpu.dot_dimension_numbers<[1], [0], [0], [1], [0, 0, 1, 1], [], []>} : vector<16x64xf32>, vector<64x32xf32>, vector<16x32xf32> -> vector<16x32xf32>
    %303 = vector.broadcast %179 : vector<1x32xf32> to vector<16x32xf32>
    %304 = arith.addf %302, %303 : vector<16x32xf32>
    %305 = arith.addf %259, %304 : vector<16x32xf32>
    %c2 = arith.constant 2 : index
    %c0_90 = arith.constant 0 : index
    %c0_91 = arith.constant 0 : index
    %306 = vector.load %arg6[%c2, %c0_90, %c0_91] : memref<3x8x128xf32, #tpu.memory_space<vmem>>, vector<1x8x128xf32>
    %307 = vector.shape_cast %306 : vector<1x8x128xf32> to vector<8x128xf32>
    %308 = vector.extract_strided_slice %307 {offsets = [0, 0], sizes = [1, 32], strides = [1, 1]} : vector<8x128xf32> to vector<1x32xf32>
    %309 = vector.extract_strided_slice %307 {offsets = [1, 0], sizes = [1, 32], strides = [1, 1]} : vector<8x128xf32> to vector<1x32xf32>
    %cst_92 = arith.constant dense<0.000000e+00> : vector<16xf32>
    %310 = vector.multi_reduction <add>, %305, %cst_92 [1] : vector<16x32xf32> to vector<16xf32>
    %311 = vector.shape_cast %310 : vector<16xf32> to vector<16x1xf32>
    %cst_93 = arith.constant 3.200000e+01 : f32
    %312 = vector.broadcast %cst_93 : f32 to vector<16x1xf32>
    %313 = arith.divf %311, %312 : vector<16x1xf32>
    %314 = vector.broadcast %313 : vector<16x1xf32> to vector<16x32xf32>
    %315 = arith.subf %305, %314 : vector<16x32xf32>
    %316 = arith.mulf %315, %315 : vector<16x32xf32>
    %cst_94 = arith.constant dense<0.000000e+00> : vector<16xf32>
    %317 = vector.multi_reduction <add>, %316, %cst_94 [1] : vector<16x32xf32> to vector<16xf32>
    %318 = vector.shape_cast %317 : vector<16xf32> to vector<16x1xf32>
    %cst_95 = arith.constant 3.200000e+01 : f32
    %319 = vector.broadcast %cst_95 : f32 to vector<16x1xf32>
    %320 = arith.divf %318, %319 : vector<16x1xf32>
    %321 = vector.broadcast %313 : vector<16x1xf32> to vector<16x32xf32>
    %322 = arith.subf %305, %321 : vector<16x32xf32>
    %cst_96 = arith.constant 9.99999997E-7 : f32
    %323 = vector.broadcast %cst_96 : f32 to vector<16x1xf32>
    %324 = arith.addf %320, %323 : vector<16x1xf32>
    %325 = math.rsqrt %324 : vector<16x1xf32>
    %326 = vector.broadcast %325 : vector<16x1xf32> to vector<16x32xf32>
    %327 = arith.mulf %322, %326 : vector<16x32xf32>
    %328 = vector.broadcast %308 : vector<1x32xf32> to vector<16x32xf32>
    %329 = arith.mulf %327, %328 : vector<16x32xf32>
    %330 = vector.broadcast %309 : vector<1x32xf32> to vector<16x32xf32>
    %331 = arith.addf %329, %330 : vector<16x32xf32>
    %c0_97 = arith.constant 0 : index
    %c0_98 = arith.constant 0 : index
    %332 = vector.load %arg7[%c0_97, %c0_98] : memref<16x32xf32, #tpu.memory_space<vmem>>, vector<16x32xf32>
    tpu.vector_store %arg7[%c0_97, %c0_98], %331 {strides = array<i32>} : memref<16x32xf32, #tpu.memory_space<vmem>>, vector<16x32xf32>,
    return
  }
}

</mosaic_0001>

<bundles_post_ra>
// kernel: smyrf_encoder_forward.1
= control target key start
LH: loop header
LB: loop body
LE: loop exit
PB: predicated region body
PF: predicated region fallthrough
CT: control target
= control target key end

     0   :  { %vm77_vm0 = vcmask 261120   ;;  %s2565_s0 = inlined_call_operand.vmem [shape: f32[16,32], index: 0, kind: input, shape index: {}]   ;;  %s2566_s1 = inlined_call_operand.vmem [shape: f32[16,32], index: 1, kind: input, shape index: {}]   ;;  %s2567_s2 = inlined_call_operand.vmem [shape: f32[2,32,96], index: 2, kind: input, shape index: {}]   ;;  %s2568_s3 = inlined_call_operand.vmem [shape: f32[2,4,8,32], index: 3, kind: input, shape index: {}]   ;;  %s2569_s4 = inlined_call_operand.vmem [shape: f32[2,32,64], index: 4, kind: input, shape index: {}]   ;;  %s2570_s5 = inlined_call_operand.vmem [shape: f32[2,64,32], index: 5, kind: input, shape index: {}]   ;;  %s2571_s6 = inlined_call_operand.vmem [shape: f32[3,8,128], index: 6, kind: input, shape index: {}]   ;;  %s2572_s7 = inlined_call_operand.hbm [shape: f32[16,32], index: 7, kind: output, shape index: {}]  }
   0x1   :  { %v71_v0 = vld [vmem:[%s2565_s0 + $0x8] sm:$0xff] }
   0x2   :  { %v73_v1 = vld [vmem:[%s2566_s1 + $0x8] sm:$0xff] }
   0x3   :  { %v2008_v2 = vadd.f32 %v73_v1, %v71_v0 }
   0x4   :  { %12 = vsyncpa [#allocation3], 0  ;;  %v70_v3 = vld [vmem:[%s2565_s0] sm:$0xff]  ;;  %v1953_v8 = vmov 32.0   ;;  %v138_v25 = vld [vmem:[%s2567_s2 + $0x18] sm:$0xff]  ;;  %s1954_s17 = smov 120  }
   0x5   :  { %v72_v4 = vld [vmem:[%s2566_s1] sm:$0xff]  ;;  %v81_v5 = vsel %vm77_vm0, %v2008_v2, 0.0  ;;  %1833 = vrcp.f32 %v1953_v8  ;;  %1778 = vmatpush.msra.mxu2 %v138_v25  ;;  %158 = vmatpush.msra.mxu0 %v138_v25  ;;  %v137_v26 = vld [vmem:[%s2567_s2 + $0x10] sm:$0xff]  ;;  %v136_v27 = vld [vmem:[%s2567_s2 + $0x8] sm:$0xff]  ;;  %s1955_s18 = smov 112   ;;  %s1956_s19 = smov 96  }
   0x6   :  { %82 = vadd.xlane.f32.xlu0 %v81_v5  ;;  %v2018_v6 = vadd.f32 %v72_v4, %v70_v3  ;;  %v135_v28 = vld [vmem:[%s2567_s2] sm:$0xff]  ;;  %s1957_s20 = smov 104   ;;  %vm187_vm8 = vcmask 64512   ;;  %vm336_vm10 = vcmask 130048   ;;  %s1958_s21 = smov 64  }
   0x7   :  { %1779 = vmatpush.msra.mxu2 %v137_v26  ;;  %159 = vmatpush.msra.mxu0 %v137_v26  ;;  %v2047_v40 = vld [vmem:[%s2571_s6] sm:$0xff]  ;;  %s1960_s26 = smov 128   ;;  %s1961_s27 = smov 8  }
   0x8   :  { %v78_v7 = vsel %vm77_vm0, %v2018_v6, 0.0  ;;  %v129_v44 = vperm.slane %v2047_v40, 0  ;;  %v132_v48 = vperm.slane %v2047_v40, 1  ;;  %v139_v58 = vperm.slane %v2047_v40, 7 }
   0x9   :  { %1780 = vmatpush.msra.mxu2 %v136_v27  ;;  %160 = vmatpush.msra.mxu0 %v136_v27 }
   0xb   :  { %v1834_v9 = vpop.eup %1833  ;;  %1781 = vmatpush.msra.mxu2 %v135_v28  ;;  %161 = vmatpush.msra.mxu0 %v135_v28 }
   0xc   :  { %v85_v10 = vmul.f32 32.0, %v1834_v9  ;;  %vm89_vm1 = vweird.f32 %v1834_v9 }
   0xe   :  { %79 = vadd.xlane.f32.xlu0 %v78_v7  ;;  %v86_v11 = vsub.f32 1.0, %v85_v10 }
  0x10   :  { %v87_v12 = vmul.f32 %v1834_v9, %v86_v11 }
  0x12   :  { %v88_v13 = vadd.f32 %v1834_v9, %v87_v12 }
  0x14   :  { %v2022_v14 = vsel %vm89_vm1, %v1834_v9, %v88_v13 }
  0x79   :  { %v83_v15 = vpop.xlane.xlu0 %82 }
  0x7a   :  { %v92_v16 = vmul.f32 %v2022_v14, %v83_v15 }
  0x7c   :  { %v94_v17 = vsub.f32 %v2008_v2, %v92_v16  ;;  %v27_v16 = vlaneseq }
  0x7e   :  { %v96_v18 = vmul.f32 %v94_v17, %v94_v17 }
  0x80   :  { %v100_v19 = vsel %vm77_vm0, %v96_v18, 0.0  ;;  %v31_v18 = vand.u32 127, %v27_v16 }
  0x81   :  { %101 = vadd.xlane.f32.xlu1 %v100_v19  ;;  %v80_v20 = vpop.xlane.xlu0 %79 }
  0x82   :  { %v91_v21 = vmul.f32 %v2022_v14, %v80_v20  ;;  %v60_v20 = vand.u32 1, %v31_v18 }
  0x84   :  { %v93_v22 = vsub.f32 %v2018_v6, %v91_v21 }
  0x86   :  { %v95_v23 = vmul.f32 %v93_v22, %v93_v22 }
  0x88   :  { %v97_v24 = vsel %vm77_vm0, %v95_v23, 0.0 }
  0x89   :  { %98 = vadd.xlane.f32.xlu1 %v97_v24 }
  0xf4   :  { %v102_v29 = vpop.xlane.xlu1 %101 }
  0xf5   :  { %v104_v30 = vmul.f32 %v102_v29, %v2022_v14 }
  0xf7   :  { %v106_v31 = vadd.f32 1e-06, %v104_v30 }
  0xf9   :  { %1835 = vrsqrt.f32 %v106_v31  ;;  %vm123_vm3 = vweird.f32 %v106_v31 }
  0xfc   :  { %v99_v32 = vpop.xlane.xlu1 %98 }
  0xfd   :  { %v103_v33 = vmul.f32 %v99_v32, %v2022_v14 }
  0xff   :  { %v1836_v34 = vpop.eup %1835  ;;  %v105_v35 = vadd.f32 1e-06, %v103_v33 }
 0x100   :  { %v118_v36 = vmul.f32 %v1836_v34, %v106_v31  ;;  %vm124_vm2 = vweird.f32 %v1836_v34 }
 0x101   :  { %1837 = vrsqrt.f32 %v105_v35  ;;  %vm125_vm4 = vmor %vm123_vm3, %vm124_vm2  ;;  %vm113_vm6 = vweird.f32 %v105_v35  ;;  %vm815_vm3 = vcmask 523264  }
 0x102   :  { %v119_v37 = vmul.f32 %v1836_v34, %v118_v36 }
 0x104   :  { %v120_v38 = vmul.f32 0.5, %v119_v37 }
 0x106   :  { %v121_v39 = vsub.f32 1.5, %v120_v38 }
 0x107   :  { %v1838_v41 = vpop.eup %1837 }
 0x108   :  { %v122_v42 = vmul.f32 %v1836_v34, %v121_v39  ;;  %v108_v43 = vmul.f32 %v1838_v41, %v105_v35  ;;  %vm114_vm5 = vweird.f32 %v1838_v41 }
 0x109   :  { %vm115_vm7 = vmor %vm113_vm6, %vm114_vm5 }
 0x10a   :  { %v126_v45 = vsel %vm125_vm4, %v1836_v34, %v122_v42  ;;  %v109_v46 = vmul.f32 %v1838_v41, %v108_v43 }
 0x10b   :  { %v128_v47 = vmul.f32 %v126_v45, %v94_v17  ;;  %v28_v17 = vshrl.u32 %v27_v16, 7 }
 0x10c   :  { %v110_v49 = vmul.f32 0.5, %v109_v46 }
 0x10d   :  { %v131_v50 = vmul.f32 %v129_v44, %v128_v47  ;;  %v36_v19 = vand.u32 1, %v28_v17  ;;  %v29_v21 = vadd.s32 8, %v28_v17 }
 0x10e   :  { %v111_v51 = vsub.f32 1.5, %v110_v49 }
 0x10f   :  { %v134_v52 = vadd.f32 %v132_v48, %v131_v50  ;;  %vm2124_vm9 = vcmp.eq.s32.totalorder %v36_v19, %v60_v20  ;;  %v43_v24 = vand.u32 1, %v29_v21 }
 0x110   :  { %v112_v53 = vmul.f32 %v1838_v41, %v111_v51 }
 0x111   :  { %1681 = vmatmul.msk.f32.vlgmr.msra.gmra.mxu2 %vm77_vm0, %v134_v52  ;;  %vm2131_vm11 = vcmp.eq.s32.totalorder %v43_v24, %v60_v20 }
 0x112   :  { %v116_v54 = vsel %vm115_vm7, %v1838_v41, %v112_v53 }
 0x113   :  { %v127_v55 = vmul.f32 %v116_v54, %v93_v22 }
 0x115   :  { %v130_v56 = vmul.f32 %v129_v44, %v127_v55 }
 0x117   :  { %v133_v57 = vadd.f32 %v132_v48, %v130_v56 }
 0x119   :  { %1680 = vmatmul.msk.f32.vlgmr.msra.gmra.mxu0 %vm77_vm0, %v133_v57 }
 0x194   :  { %v166_v59 = vpop.f32.mrf.mxu2 }
 0x195   :  { %v2054_v60 = vadd.f32 %v166_v59, %v139_v58 }
 0x196   :  { %v163_v61 = vpop.f32.mrf.mxu0 }
 0x197   :  { %v2056_v62 = vadd.f32 %v163_v61, %v139_v58  ;;  %173 = vrot.lane.b32.xlu2 %v2054_v60, %s1954_s17 }
 0x199   :  { %175 = vrot.lane.b32.xlu1 %v2056_v62, %s1955_s18  ;;  %171 = vrot.lane.b32.xlu0 %v2056_v62, %s1954_s17 }
 0x19f   :  { %177 = vrot.lane.b32.xlu2 %v2054_v60, %s1955_s18 }
 0x1a1   :  { %183 = vrot.lane.b32.xlu0 %v2056_v62, %s1956_s19 }
 0x1a7   :  { %179 = vrot.lane.b32.xlu2 %v2056_v62, %s1957_s20 }
 0x1af   :  { %181 = vrot.lane.b32.xlu2 %v2054_v60, %s1957_s20 }
 0x1b7   :  { %185 = vrot.lane.b32.xlu2 %v2054_v60, %s1956_s19 }
 0x1f1   :  { %v2074_v63 = vpop.permute.xlu2 %173 }
 0x1f2   :  { %221 = vrot.lane.b32.xlu2 %v2074_v63, %s1956_s19 }
 0x1f9   :  { %v2078_v0 = vpop.permute.xlu2 %177 }
 0x1fa   :  { %256 = vrot.lane.b32.xlu1 %v2078_v0, %s1956_s19 }
 0x201   :  { %v2082_v1 = vpop.permute.xlu2 %179 }
 0x209   :  { %v2084_v3 = vpop.permute.xlu2 %181 }
 0x20a   :  { %291 = vrot.lane.b32.xlu1 %v2084_v3, %s1956_s19 }
 0x20b   :  { %v2088_v4 = vpop.permute.xlu1 %175  ;;  %v2090_v5 = vpop.permute.xlu0 %171 }
 0x20c   :  { %254 = vrot.lane.b32.xlu2 %v2088_v4, %s1956_s19  ;;  %219 = vrot.lane.b32.xlu0 %v2090_v5, %s1956_s19  ;;  %v1793_v50 = vpack.i.bf16 %v2090_v5, %v2074_v63  ;;  %v1798_v17 = vpack.i.bf16 %v2088_v4, %v2078_v0 }
 0x211   :  { %v186_v7 = vpop.permute.xlu2 %185 }
 0x212   :  { %1682 = vmatpush.xpose.msk.msra.mxu1 %vm187_vm8, %v186_v7  ;;  %1782 = vmatpush.xpose.msk.msra.mxu3 %vm187_vm8, %v186_v7 }
 0x213   :  { %v184_v8 = vpop.permute.xlu0 %183 }
 0x214   :  { %289 = vrot.lane.b32.xlu0 %v2082_v1, %s1956_s19 }
 0x216   :  { %1683 = vmatpush.xpose.msk.msra.mxu1 %vm187_vm8, %v184_v8  ;;  %1783 = vmatpush.xpose.msk.msra.mxu3 %vm187_vm8, %v184_v8 }
 0x219   :  { %1684 = vmatmul.msk.f32.vlgmr.msra.gmra.mxu1 %vm187_vm8, %v2056_v62  ;;  %1685 = vmatmul.msk.f32.vlgmr.msra.gmra.mxu3 %vm187_vm8, %v2054_v60 }
 0x24c   :  { %v222_v9 = vpop.permute.xlu2 %221 }
 0x24d   :  { %1686 = vmatpush.xpose.msk.msrb.mxu2 %vm187_vm8, %v222_v9 }
 0x266   :  { %v255_v11 = vpop.permute.xlu2 %254 }
 0x26c   :  { %v257_v10 = vpop.permute.xlu1 %256 }
 0x26d   :  { %1690 = vmatpush.xpose.msk.msrb.mxu3 %vm187_vm8, %v257_v10 }
 0x271   :  { %1691 = vmatpush.xpose.msk.msrb.mxu3 %vm187_vm8, %v255_v11 }
 0x274   :  { %1692 = vmatmul.msk.f32.vlgmr.msrb.gmra.mxu3 %vm187_vm8, %v2088_v4 }
 0x27c   :  { %v292_v12 = vpop.permute.xlu1 %291  ;;  %1693 = vmatmul.msk.f32.gmra.mxu3 %vm187_vm8, %v2078_v0 }
 0x27d   :  { %1694 = vmatpush.xpose.msk.msrb.mxu0 %vm187_vm8, %v292_v12 }
 0x27e   :  { %v220_v13 = vpop.permute.xlu0 %219 }
 0x27f   :  { %1687 = vmatpush.xpose.msk.msrb.mxu2 %vm187_vm8, %v220_v13 }
 0x282   :  { %1688 = vmatmul.msk.f32.vlgmr.msrb.gmra.mxu2 %vm187_vm8, %v2090_v5 }
 0x286   :  { %v290_v15 = vpop.permute.xlu0 %289 }
 0x287   :  { %1695 = vmatpush.xpose.msk.msrb.mxu0 %vm187_vm8, %v290_v15 }
 0x28a   :  { %1689 = vmatmul.msk.f32.gmra.mxu2 %vm187_vm8, %v2074_v63  ;;  %1696 = vmatmul.msk.f32.vlgmr.msrb.gmra.mxu0 %vm187_vm8, %v2082_v1 }
 0x292   :  { %1697 = vmatmul.msk.f32.gmra.mxu0 %vm187_vm8, %v2084_v3 }
 0x296   :  { %v213_v23 = vpop.f32.mrf.mxu1 }
 0x297   :  { %v328_v25 = vsel %vm2124_vm9, %v213_v23, -1e+30  ;;  %v1803_v23 = vpack.i.bf16 %v2056_v62, %v2054_v60 }
 0x298   :  { %v337_v26 = vsel %vm336_vm10, %v328_v25, -inf }
 0x299   :  { %338 = vmax.xlane.f32.xlu1 %v337_v26 }
 0x29c   :  { %v216_v28 = vpop.f32.mrf.mxu3 }
 0x29d   :  { %v2137_v29 = vsel %vm2131_vm11, %v216_v28, -1e+30 }
 0x29e   :  { %v340_v30 = vsel %vm336_vm10, %v2137_v29, -inf }
 0x29f   :  { %341 = vmax.xlane.f32.xlu2 %v340_v30 }
 0x2f7   :  { %v283_v31 = vpop.f32.mrf.mxu3 }
 0x2f8   :  { %v332_v32 = vsel %vm2124_vm9, %v283_v31, -1e+30 }
 0x2f9   :  { %v349_v33 = vsel %vm336_vm10, %v332_v32, -inf }
 0x2fa   :  { %350 = vmax.xlane.f32.xlu1 %v349_v33 }
 0x2ff   :  { %v286_v39 = vpop.f32.mrf.mxu3 }
 0x300   :  { %v2152_v42 = vsel %vm2131_vm11, %v286_v39, -1e+30 }
 0x301   :  { %v352_v46 = vsel %vm336_vm10, %v2152_v42, -inf }
 0x305   :  { %v248_v34 = vpop.f32.mrf.mxu2 }
 0x306   :  { %v330_v35 = vsel %vm2124_vm9, %v248_v34, -1e+30 }
 0x307   :  { %v318_v36 = vpop.f32.mrf.mxu0  ;;  %v343_v37 = vsel %vm336_vm10, %v330_v35, -inf }
 0x308   :  { %v334_v38 = vsel %vm2124_vm9, %v318_v36, -1e+30  ;;  %344 = vmax.xlane.f32.xlu2 %v343_v37 }
 0x309   :  { %v355_v41 = vsel %vm336_vm10, %v334_v38, -inf }
 0x30a   :  { %356 = vmax.xlane.f32.xlu0 %v355_v41 }
 0x30c   :  { %v339_v51 = vpop.xlane.xlu1 %338 }
 0x30d   :  { %v251_v43 = vpop.f32.mrf.mxu2  ;;  %v361_v7 = vsub.f32 %v328_v25, %v339_v51 }
 0x30e   :  { %v331_v44 = vsel %vm2131_vm11, %v251_v43, -1e+30 }
 0x30f   :  { %v321_v45 = vpop.f32.mrf.mxu0  ;;  %v346_v49 = vsel %vm336_vm10, %v331_v44, -inf  ;;  %v369_v5 = vmul.f32 1.442695, %v361_v7 }
 0x310   :  { %v2160_v47 = vsel %vm2131_vm11, %v321_v45, -1e+30  ;;  %353 = vmax.xlane.f32.xlu2 %v352_v46 }
 0x311   :  { %v358_v48 = vsel %vm336_vm10, %v2160_v47, -inf }
 0x312   :  { %359 = vmax.xlane.f32.xlu1 %v358_v48  ;;  %347 = vmax.xlane.f32.xlu0 %v346_v49  ;;  %v342_v55 = vpop.xlane.xlu2 %341 }
 0x313   :  { %v362_v24 = vsub.f32 %v2137_v29, %v342_v55 }
 0x315   :  { %v371_v25 = vmul.f32 1.442695, %v362_v24 }
 0x32b   :  { %1794 = vrot.lane.b32.xlu1 %v1793_v50, %s1958_s21 }
 0x36d   :  { %v351_v52 = vpop.xlane.xlu1 %350 }
 0x36e   :  { %v365_v53 = vsub.f32 %v332_v32, %v351_v52 }
 0x370   :  { %v377_v54 = vmul.f32 1.442695, %v365_v53 }
 0x372   :  { %1839 = vpow2.f32 %v377_v54 }
 0x378   :  { %v1840_v56 = vpop.eup %1839 }
 0x379   :  { %v397_v57 = vsel %vm336_vm10, %v1840_v56, 0.0 }
 0x37a   :  { %398 = vadd.xlane.f32.xlu2 %v397_v57 }
 0x37b   :  { %v345_v58 = vpop.xlane.xlu2 %344 }
 0x37c   :  { %v363_v59 = vsub.f32 %v330_v35, %v345_v58  ;;  %v1808_v35 = vpack.i.bf16 %v2082_v1, %v2084_v3 }
 0x37d   :  { %v357_v61 = vpop.xlane.xlu0 %356 }
 0x37e   :  { %v373_v8 = vmul.f32 1.442695, %v363_v59  ;;  %v367_v9 = vsub.f32 %v334_v38, %v357_v61 }
 0x380   :  { %1841 = vpow2.f32 %v373_v8  ;;  %v381_v63 = vmul.f32 1.442695, %v367_v9 }
 0x382   :  { %1843 = vpow2.f32 %v381_v63 }
 0x383   :  { %1845 = vpow2.f32 %v369_v5  ;;  %v354_v31 = vpop.xlane.xlu2 %353 }
 0x384   :  { %1847 = vpow2.f32 %v371_v25  ;;  %v366_v32 = vsub.f32 %v2152_v42, %v354_v31  ;;  %v568_v25 = vld [vmem:[%s2568_s3 + $0x18] sm:$0xff] }
 0x385   :  { %v360_v18 = vpop.xlane.xlu1 %359  ;;  %v348_v0 = vpop.xlane.xlu0 %347 }
 0x386   :  { %v1842_v10 = vpop.eup %1841  ;;  %v364_v28 = vsub.f32 %v331_v44, %v348_v0  ;;  %v379_v33 = vmul.f32 1.442695, %v366_v32  ;;  %v368_v45 = vsub.f32 %v2160_v47, %v360_v18 }
 0x387   :  { %v391_v11 = vsel %vm336_vm10, %v1842_v10, 0.0 }
 0x388   :  { %v2170_v12 = vpop.eup %1843  ;;  %392 = vadd.xlane.f32.xlu0 %v391_v11  ;;  %v375_v30 = vmul.f32 1.442695, %v364_v28  ;;  %v383_v1 = vmul.f32 1.442695, %v368_v45  ;;  %v567_v11 = vld [vmem:[%s2568_s3 + $0x10] sm:$0xff] }
 0x389   :  { %v403_v13 = vsel %vm336_vm10, %v2170_v12, 0.0  ;;  %v2174_v15 = vpop.eup %1845 }
 0x38a   :  { %404 = vadd.xlane.f32.xlu1 %v403_v13  ;;  %v385_v16 = vsel %vm336_vm10, %v2174_v15, 0.0  ;;  %v1848_v26 = vpop.eup %1847  ;;  %1849 = vpow2.f32 %v375_v30 }
 0x38b   :  { %v388_v4 = vsel %vm336_vm10, %v1848_v26, 0.0  ;;  %1851 = vpow2.f32 %v379_v33 }
 0x390   :  { %386 = vadd.xlane.f32.xlu0 %v385_v16  ;;  %v1850_v34 = vpop.eup %1849  ;;  %v566_v16 = vld [vmem:[%s2568_s3 + $0x8] sm:$0xff] }
 0x391   :  { %v394_v60 = vsel %vm336_vm10, %v1850_v34, 0.0  ;;  %v1852_v62 = vpop.eup %1851 }
 0x392   :  { %1799 = vrot.lane.b32.xlu2 %v1798_v17, %s1958_s21  ;;  %v400_v29 = vsel %vm336_vm10, %v1852_v62, 0.0  ;;  %v565_v17 = vld [vmem:[%s2568_s3] sm:$0xff] }
 0x39d   :  { %v1795_v19 = vpop.permute.xlu1 %1794 }
 0x39e   :  { %v1796_v20 = vunpack.i.l.bf16 %v1795_v19  ;;  %v1797_v21 = vunpack.i.h.bf16 %v1795_v19 }
 0x3a0   :  { %486 = vmatpush.msra.mxu2 %v1796_v20 }
 0x3a2   :  { %487 = vmatpush.msra.mxu2 %v1797_v21 }
 0x3a4   :  { %1804 = vrot.lane.b32.xlu0 %v1803_v23, %s1958_s21  ;;  %619 = vmatpush.msrb.mxu2 %v566_v16 }
 0x3bb   :  { %389 = vadd.xlane.f32.xlu2 %v388_v4 }
 0x3ce   :  { %395 = vadd.xlane.f32.xlu0 %v394_v60 }
 0x3d6   :  { %401 = vadd.xlane.f32.xlu0 %v400_v29 }
 0x3ea   :  { %1809 = vrot.lane.b32.xlu0 %v1808_v35, %s1958_s21 }
 0x3ed   :  { %v399_v36 = vpop.xlane.xlu2 %398 }
 0x3ee   :  { %1853 = vrcp.f32 %v399_v36  ;;  %v699_v36 = vperm.slane %v2047_v40, 4 }
 0x3f4   :  { %v1854_v38 = vpop.eup %1853 }
 0x3f5   :  { %v1800_v37 = vpop.permute.xlu2 %1799  ;;  %v421_v42 = vmul.f32 %v1854_v38, %v1840_v56 }
 0x3f6   :  { %v1801_v39 = vunpack.i.l.bf16 %v1800_v37  ;;  %v1802_v41 = vunpack.i.h.bf16 %v1800_v37 }
 0x3f8   :  { %521 = vmatpush.msra.mxu3 %v1801_v39 }
 0x3fa   :  { %522 = vmatpush.msra.mxu3 %v1802_v41 }
 0x3fb   :  { %v393_v43 = vpop.xlane.xlu0 %392  ;;  %1702 = vmatmul.msk.f32.vlgmr.msra.gmra.mxu3 %vm336_vm10, %v421_v42 }
 0x3fc   :  { %1855 = vrcp.f32 %v393_v43  ;;  %648 = vmatpush.msrb.mxu3 %v567_v11 }
 0x3fd   :  { %1857 = vpow2.f32 %v383_v1  ;;  %v405_v9 = vpop.xlane.xlu1 %404 }
 0x402   :  { %v1856_v44 = vpop.eup %1855 }
 0x403   :  { %v419_v46 = vmul.f32 %v1856_v44, %v1842_v10  ;;  %v387_v3 = vpop.xlane.xlu0 %386  ;;  %v1858_v48 = vpop.eup %1857 }
 0x404   :  { %1859 = vrcp.f32 %v387_v3  ;;  %v406_v49 = vsel %vm336_vm10, %v1858_v48, 0.0 }
 0x405   :  { %1700 = vmatmul.msk.f32.vlgmr.msra.gmra.mxu2 %vm336_vm10, %v419_v46 }
 0x40a   :  { %v1860_v51 = vpop.eup %1859 }
 0x40b   :  { %v417_v54 = vmul.f32 %v1860_v51, %v2174_v15 }
 0x414   :  { %407 = vadd.xlane.f32.xlu0 %v406_v49 }
 0x416   :  { %v1805_v50 = vpop.permute.xlu0 %1804 }
 0x417   :  { %v1806_v52 = vunpack.i.l.bf16 %v1805_v50  ;;  %v1807_v53 = vunpack.i.h.bf16 %v1805_v50 }
 0x419   :  { %451 = vmatpush.msrb.mxu1 %v1806_v52 }
 0x41b   :  { %452 = vmatpush.msrb.mxu1 %v1807_v53 }
 0x41c   :  { %1698 = vmatmul.msk.f32.vlgmr.msrb.gmra.mxu1 %vm336_vm10, %v417_v54 }
 0x41d   :  { %590 = vmatpush.msra.mxu1 %v565_v17 }
 0x42e   :  { %v390_v47 = vpop.xlane.xlu2 %389 }
 0x42f   :  { %1861 = vrcp.f32 %v390_v47 }
 0x435   :  { %v1862_v55 = vpop.eup %1861 }
 0x436   :  { %v418_v56 = vmul.f32 %v1862_v55, %v1848_v26 }
 0x438   :  { %1699 = vmatmul.msk.f32.gmra.mxu1 %vm336_vm10, %v418_v56 }
 0x441   :  { %v396_v57 = vpop.xlane.xlu0 %395 }
 0x442   :  { %1863 = vrcp.f32 %v396_v57 }
 0x448   :  { %v1864_v58 = vpop.eup %1863 }
 0x449   :  { %v402_v59 = vpop.xlane.xlu0 %401  ;;  %v420_v61 = vmul.f32 %v1864_v58, %v1850_v34 }
 0x44a   :  { %1865 = vrcp.f32 %v402_v59 }
 0x44b   :  { %1701 = vmatmul.msk.f32.gmra.mxu2 %vm336_vm10, %v420_v61  ;;  %1867 = vrcp.f32 %v405_v9  ;;  %v757_v9 = vld [vmem:[%s2569_s4 + $0x18] sm:$0xff] }
 0x44c   :  { %777 = vmatpush.msrb.mxu1 %v757_v9 }
 0x450   :  { %v1866_v7 = vpop.eup %1865 }
 0x451   :  { %v422_v8 = vmul.f32 %v1866_v7, %v1852_v62  ;;  %v1868_v5 = vpop.eup %1867 }
 0x452   :  { %v423_v15 = vmul.f32 %v1868_v5, %v2170_v12  ;;  %v755_v5 = vld [vmem:[%s2569_s4 + $0x8] sm:$0xff] }
 0x453   :  { %1703 = vmatmul.msk.f32.gmra.mxu3 %vm336_vm10, %v422_v8 }
 0x45c   :  { %v1810_v63 = vpop.permute.xlu0 %1809 }
 0x45d   :  { %v1811_v10 = vunpack.i.l.bf16 %v1810_v63  ;;  %v1812_v13 = vunpack.i.h.bf16 %v1810_v63  ;;  %v756_v63 = vld [vmem:[%s2569_s4 + $0x10] sm:$0xff] }
 0x45e   :  { %778 = vmatpush.msrb.mxu1 %v756_v63 }
 0x45f   :  { %556 = vmatpush.msra.mxu0 %v1811_v10  ;;  %v754_v10 = vld [vmem:[%s2569_s4] sm:$0xff] }
 0x460   :  { %779 = vmatpush.msrb.mxu1 %v755_v5 }
 0x461   :  { %557 = vmatpush.msra.mxu0 %v1812_v13 }
 0x462   :  { %1704 = vmatmul.msk.f32.vlgmr.msra.gmra.mxu0 %vm336_vm10, %v423_v15  ;;  %780 = vmatpush.msrb.mxu1 %v754_v10 }
 0x463   :  { %677 = vmatpush.msrb.mxu0 %v568_v25  ;;  %v751_v25 = vperm.slane %v2047_v40, 3 }
 0x47e   :  { %v524_v18 = vpop.f32.mrf.mxu3 }
 0x47f   :  { %1710 = vmatmul.msk.f32.vlgmr.msrb.gmra.mxu3 %vm187_vm8, %v524_v18 }
 0x487   :  { %v408_v19 = vpop.xlane.xlu0 %407 }
 0x488   :  { %1869 = vrcp.f32 %v408_v19  ;;  %v489_v20 = vpop.f32.mrf.mxu2 }
 0x489   :  { %1708 = vmatmul.msk.f32.vlgmr.msrb.gmra.mxu2 %vm187_vm8, %v489_v20 }
 0x48e   :  { %v1870_v12 = vpop.eup %1869 }
 0x48f   :  { %v424_v21 = vmul.f32 %v1870_v12, %v1858_v48 }
 0x491   :  { %1705 = vmatmul.msk.f32.gmra.mxu0 %vm336_vm10, %v424_v21  ;;  %v748_v21 = vperm.slane %v2047_v40, 2 }
 0x499   :  { %v454_v23 = vpop.f32.mrf.mxu1 }
 0x49a   :  { %1706 = vmatmul.msk.f32.vlgmr.msra.gmra.mxu1 %vm187_vm8, %v454_v23 }
 0x4b5   :  { %v457_v24 = vpop.f32.mrf.mxu1 }
 0x4b6   :  { %1707 = vmatmul.msk.f32.gmra.mxu1 %vm187_vm8, %v457_v24 }
 0x4ce   :  { %v492_v26 = vpop.f32.mrf.mxu2 }
 0x4cf   :  { %1709 = vmatmul.msk.f32.gmra.mxu2 %vm187_vm8, %v492_v26 }
 0x4d6   :  { %v527_v0 = vpop.f32.mrf.mxu3 }
 0x4d7   :  { %1711 = vmatmul.msk.f32.gmra.mxu3 %vm187_vm8, %v527_v0 }
 0x4df   :  { %v559_v4 = vpop.f32.mrf.mxu0 }
 0x4e0   :  { %1712 = vmatmul.msk.f32.vlgmr.msrb.gmra.mxu0 %vm187_vm8, %v559_v4 }
 0x502   :  { %v650_v34 = vpop.f32.mrf.mxu3 }
 0x503   :  { %v688_v62 = vsel %vm77_vm0, %v650_v34, 0.0 }
 0x50c   :  { %v621_v31 = vpop.f32.mrf.mxu2 }
 0x50d   :  { %v686_v33 = vsel %vm77_vm0, %v621_v31, 0.0 }
 0x50e   :  { %v562_v28 = vpop.f32.mrf.mxu0 }
 0x50f   :  { %1713 = vmatmul.msk.f32.gmra.mxu0 %vm187_vm8, %v562_v28 }
 0x517   :  { %v592_v30 = vpop.f32.mrf.mxu1 }
 0x518   :  { %v685_v32 = vsel %vm77_vm0, %v592_v30, 0.0 }
 0x519   :  { %v687_v60 = vadd.f32 %v686_v33, %v685_v32 }
 0x51b   :  { %v689_v35 = vadd.f32 %v688_v62, %v687_v60 }
 0x533   :  { %v595_v44 = vpop.f32.mrf.mxu1 }
 0x534   :  { %v692_v1 = vsel %vm77_vm0, %v595_v44, 0.0  ;;  %v809_v44 = vld [vmem:[%s2570_s5 + $0x18] sm:$0xff] }
 0x552   :  { %v624_v43 = vpop.f32.mrf.mxu2 }
 0x553   :  { %v693_v46 = vsel %vm77_vm0, %v624_v43, 0.0  ;;  %v810_v43 = vld [vmem:[%s2570_s5 + $0x20] sm:$0xff] }
 0x554   :  { %v694_v48 = vadd.f32 %v693_v46, %v692_v1  ;;  %v807_v46 = vld [vmem:[%s2570_s5 + $0x8] sm:$0xff]  ;;  %v806_v1 = vld [vmem:[%s2570_s5] sm:$0xff] }
 0x55a   :  { %v653_v45 = vpop.f32.mrf.mxu3 }
 0x55b   :  { %v695_v3 = vsel %vm77_vm0, %v653_v45, 0.0  ;;  %v808_v45 = vld [vmem:[%s2570_s5 + $0x10] sm:$0xff] }
 0x55c   :  { %v696_v49 = vadd.f32 %v695_v3, %v694_v48  ;;  %v758_v3 = vperm.slane %v2047_v40, 6 }
 0x55d   :  { %v679_v29 = vpop.f32.mrf.mxu0 }
 0x55e   :  { %v690_v37 = vsel %vm77_vm0, %v679_v29, 0.0 }
 0x55f   :  { %v691_v38 = vadd.f32 %v690_v37, %v689_v35 }
 0x561   :  { %v700_v39 = vadd.f32 %v699_v36, %v691_v38  ;;  %v813_v38 = vld [vmem:[%s2570_s5 + $0x38] sm:$0xff] }
 0x562   :  { %830 = vmatpush.msra.mxu2 %v813_v38  ;;  %v2327_v38 = vld [vmem:[%s2571_s6 + $0x8] sm:$0xff] }
 0x563   :  { %v2230_v41 = vadd.f32 %v700_v39, %v2018_v6  ;;  %v812_v39 = vld [vmem:[%s2570_s5 + $0x30] sm:$0xff] }
 0x564   :  { %831 = vmatpush.msra.mxu2 %v812_v39 }
 0x565   :  { %v704_v42 = vsel %vm77_vm0, %v2230_v41, 0.0 }
 0x566   :  { %705 = vadd.xlane.f32.xlu1 %v704_v42  ;;  %v811_v42 = vld [vmem:[%s2570_s5 + $0x28] sm:$0xff] }
 0x567   :  { %832 = vmatpush.msra.mxu2 %v811_v42 }
 0x569   :  { %833 = vmatpush.msra.mxu2 %v810_v43  ;;  %v893_v43 = vperm.slane %v2327_v38, 0 }
 0x56b   :  { %834 = vmatpush.msra.mxu2 %v809_v44 }
 0x56d   :  { %835 = vmatpush.msra.mxu2 %v808_v45 }
 0x56f   :  { %836 = vmatpush.msra.mxu2 %v807_v46  ;;  %v896_v46 = vperm.slane %v2327_v38, 1 }
 0x571   :  { %837 = vmatpush.msra.mxu2 %v806_v1 }
 0x58c   :  { %v682_v50 = vpop.f32.mrf.mxu0 }
 0x58d   :  { %v697_v51 = vsel %vm77_vm0, %v682_v50, 0.0 }
 0x58e   :  { %v698_v6 = vadd.f32 %v697_v51, %v696_v49 }
 0x590   :  { %v701_v52 = vadd.f32 %v699_v36, %v698_v6 }
 0x592   :  { %v2239_v53 = vadd.f32 %v701_v52, %v2008_v2 }
 0x594   :  { %v707_v54 = vsel %vm77_vm0, %v2239_v53, 0.0 }
 0x595   :  { %708 = vadd.xlane.f32.xlu2 %v707_v54 }
 0x5d9   :  { %v706_v47 = vpop.xlane.xlu1 %705 }
 0x5da   :  { %v710_v55 = vmul.f32 %v706_v47, %v2022_v14 }
 0x5dc   :  { %v712_v56 = vsub.f32 %v2230_v41, %v710_v55 }
 0x5de   :  { %v714_v57 = vmul.f32 %v712_v56, %v712_v56 }
 0x5e0   :  { %v716_v58 = vsel %vm77_vm0, %v714_v57, 0.0 }
 0x5e1   :  { %717 = vadd.xlane.f32.xlu1 %v716_v58 }
 0x608   :  { %v709_v59 = vpop.xlane.xlu2 %708 }
 0x609   :  { %v711_v61 = vmul.f32 %v709_v59, %v2022_v14 }
 0x60b   :  { %v713_v7 = vsub.f32 %v2239_v53, %v711_v61 }
 0x60d   :  { %v715_v2 = vmul.f32 %v713_v7, %v713_v7 }
 0x60f   :  { %v719_v8 = vsel %vm77_vm0, %v715_v2, 0.0 }
 0x610   :  { %720 = vadd.xlane.f32.xlu2 %v719_v8 }
 0x654   :  { %v718_v11 = vpop.xlane.xlu1 %717 }
 0x655   :  { %v722_v13 = vmul.f32 %v718_v11, %v2022_v14 }
 0x657   :  { %v724_v15 = vadd.f32 1e-06, %v722_v13  ;;  %v814_v13 = vperm.slane %v2047_v40, 5 }
 0x659   :  { %1871 = vrsqrt.f32 %v724_v15  ;;  %vm732_vm13 = vweird.f32 %v724_v15 }
 0x65f   :  { %v1872_v16 = vpop.eup %1871 }
 0x660   :  { %v727_v17 = vmul.f32 %v1872_v16, %v724_v15  ;;  %vm733_vm12 = vweird.f32 %v1872_v16 }
 0x661   :  { %vm734_vm14 = vmor %vm732_vm13, %vm733_vm12 }
 0x662   :  { %v728_v18 = vmul.f32 %v1872_v16, %v727_v17 }
 0x664   :  { %v729_v19 = vmul.f32 0.5, %v728_v18 }
 0x666   :  { %v730_v20 = vsub.f32 1.5, %v729_v19 }
 0x668   :  { %v731_v12 = vmul.f32 %v1872_v16, %v730_v20 }
 0x66a   :  { %v735_v23 = vsel %vm734_vm14, %v1872_v16, %v731_v12 }
 0x66b   :  { %v746_v24 = vmul.f32 %v735_v23, %v712_v56 }
 0x66d   :  { %v749_v26 = vmul.f32 %v748_v21, %v746_v24 }
 0x66f   :  { %v752_v0 = vadd.f32 %v751_v25, %v749_v26 }
 0x671   :  { %1714 = vmatmul.msk.f32.vlgmr.msrb.gmra.mxu1 %vm77_vm0, %v752_v0 }
 0x683   :  { %v721_v4 = vpop.xlane.xlu2 %720 }
 0x684   :  { %v723_v28 = vmul.f32 %v721_v4, %v2022_v14 }
 0x686   :  { %v725_v30 = vadd.f32 1e-06, %v723_v28 }
 0x688   :  { %1873 = vrsqrt.f32 %v725_v30  ;;  %vm742_vm1 = vweird.f32 %v725_v30 }
 0x68e   :  { %v1874_v31 = vpop.eup %1873 }
 0x68f   :  { %v737_v32 = vmul.f32 %v1874_v31, %v725_v30  ;;  %vm743_vm15 = vweird.f32 %v1874_v31  ;;  %v1722_v30 = vld [vmem:[%s2567_s2 + $0x38] sm:$0xff] }
 0x690   :  { %vm744_vm2 = vmor %vm742_vm1, %vm743_vm15  ;;  %923 = vmatpush.msra.mxu3 %v1722_v30 }
 0x691   :  { %v738_v33 = vmul.f32 %v1874_v31, %v737_v32  ;;  %v1720_v32 = vld [vmem:[%s2567_s2 + $0x28] sm:$0xff] }
 0x693   :  { %v739_v34 = vmul.f32 0.5, %v738_v33  ;;  %v1719_v33 = vld [vmem:[%s2567_s2 + $0x20] sm:$0xff] }
 0x695   :  { %v740_v60 = vsub.f32 1.5, %v739_v34 }
 0x697   :  { %v741_v62 = vmul.f32 %v1874_v31, %v740_v60 }
 0x699   :  { %v745_v29 = vsel %vm744_vm2, %v1874_v31, %v741_v62  ;;  %v1721_v31 = vld [vmem:[%s2567_s2 + $0x30] sm:$0xff] }
 0x69a   :  { %v747_v35 = vmul.f32 %v745_v29, %v713_v7  ;;  %924 = vmatpush.msra.mxu3 %v1721_v31 }
 0x69c   :  { %v750_v36 = vmul.f32 %v748_v21, %v747_v35  ;;  %925 = vmatpush.msra.mxu3 %v1720_v32 }
 0x69e   :  { %v753_v37 = vadd.f32 %v751_v25, %v750_v36  ;;  %926 = vmatpush.msra.mxu3 %v1719_v33 }
 0x6a0   :  { %1715 = vmatmul.msk.f32.gmra.mxu1 %vm77_vm0, %v753_v37 }
 0x6ee   :  { %v782_v48 = vpop.f32.mrf.mxu1 }
 0x6ef   :  { %v783_v49 = vadd.f32 %v782_v48, %v758_v3 }
 0x6f1   :  { %v788_v50 = vmul.f32 %v783_v49, %v783_v49 }
 0x6f3   :  { %v790_v51 = vmul.f32 %v788_v50, %v783_v49 }
 0x6f5   :  { %v792_v6 = vmul.f32 0.044715, %v790_v51 }
 0x6f7   :  { %v794_v52 = vadd.f32 %v792_v6, %v783_v49 }
 0x6f9   :  { %v796_v54 = vmul.f32 0.7978846, %v794_v52 }
 0x6fb   :  { %1875 = vtanh.f32 %v796_v54 }
 0x701   :  { %v1876_v47 = vpop.eup %1875 }
 0x702   :  { %v800_v55 = vadd.f32 1.0, %v1876_v47 }
 0x704   :  { %v802_v56 = vmul.f32 0.5, %v800_v55 }
 0x706   :  { %v804_v57 = vmul.f32 %v802_v56, %v783_v49 }
 0x708   :  { %1716 = vmatmul.msk.f32.vlgmr.msra.gmra.mxu2 %vm815_vm3, %v804_v57 }
 0x71d   :  { %v785_v58 = vpop.f32.mrf.mxu1 }
 0x71e   :  { %v786_v59 = vadd.f32 %v785_v58, %v758_v3 }
 0x720   :  { %v789_v61 = vmul.f32 %v786_v59, %v786_v59 }
 0x722   :  { %v791_v7 = vmul.f32 %v789_v61, %v786_v59  ;;  %v904_v61 = vperm.slane %v2327_v38, 7 }
 0x724   :  { %v793_v2 = vmul.f32 0.044715, %v791_v7 }
 0x726   :  { %v795_v8 = vadd.f32 %v793_v2, %v786_v59 }
 0x728   :  { %v797_v9 = vmul.f32 0.7978846, %v795_v8 }
 0x72a   :  { %1877 = vtanh.f32 %v797_v9 }
 0x730   :  { %v1878_v63 = vpop.eup %1877 }
 0x731   :  { %v801_v5 = vadd.f32 1.0, %v1878_v63 }
 0x733   :  { %v803_v10 = vmul.f32 0.5, %v801_v5 }
 0x735   :  { %v805_v11 = vmul.f32 %v803_v10, %v786_v59 }
 0x737   :  { %1717 = vmatmul.msk.f32.gmra.mxu2 %vm815_vm3, %v805_v11 }
 0x78b   :  { %v839_v15 = vpop.f32.mrf.mxu2 }
 0x78c   :  { %v840_v16 = vadd.f32 %v839_v15, %v814_v13 }
 0x78e   :  { %v2296_v17 = vadd.f32 %v840_v16, %v2230_v41 }
 0x790   :  { %v849_v18 = vsel %vm77_vm0, %v2296_v17, 0.0 }
 0x791   :  { %850 = vadd.xlane.f32.xlu1 %v849_v18 }
 0x7ba   :  { %v842_v19 = vpop.f32.mrf.mxu2 }
 0x7bb   :  { %v843_v20 = vadd.f32 %v842_v19, %v814_v13 }
 0x7bd   :  { %v2301_v12 = vadd.f32 %v843_v20, %v2239_v53 }
 0x7bf   :  { %v852_v21 = vsel %vm77_vm0, %v2301_v12, 0.0 }
 0x7c0   :  { %853 = vadd.xlane.f32.xlu2 %v852_v21 }
 0x804   :  { %v851_v23 = vpop.xlane.xlu1 %850 }
 0x805   :  { %v855_v40 = vmul.f32 %v851_v23, %v2022_v14 }
 0x807   :  { %v857_v24 = vsub.f32 %v2296_v17, %v855_v40 }
 0x809   :  { %v859_v41 = vmul.f32 %v857_v24, %v857_v24 }
 0x80b   :  { %v861_v25 = vsel %vm77_vm0, %v859_v41, 0.0 }
 0x80c   :  { %862 = vadd.xlane.f32.xlu1 %v861_v25 }
 0x833   :  { %v854_v26 = vpop.xlane.xlu2 %853 }
 0x834   :  { %v856_v0 = vmul.f32 %v854_v26, %v2022_v14 }
 0x836   :  { %v858_v4 = vsub.f32 %v2301_v12, %v856_v0 }
 0x838   :  { %v860_v53 = vmul.f32 %v858_v4, %v858_v4 }
 0x83a   :  { %v864_v28 = vsel %vm77_vm0, %v860_v53, 0.0 }
 0x83b   :  { %865 = vadd.xlane.f32.xlu2 %v864_v28 }
 0x87f   :  { %v863_v34 = vpop.xlane.xlu1 %862 }
 0x880   :  { %v867_v60 = vmul.f32 %v863_v34, %v2022_v14 }
 0x882   :  { %v869_v62 = vadd.f32 1e-06, %v867_v60 }
 0x884   :  { %1879 = vrsqrt.f32 %v869_v62  ;;  %vm877_vm5 = vweird.f32 %v869_v62 }
 0x88a   :  { %v1880_v29 = vpop.eup %1879 }
 0x88b   :  { %v872_v35 = vmul.f32 %v1880_v29, %v869_v62  ;;  %vm878_vm4 = vweird.f32 %v1880_v29 }
 0x88c   :  { %vm879_vm6 = vmor %vm877_vm5, %vm878_vm4 }
 0x88d   :  { %v873_v36 = vmul.f32 %v1880_v29, %v872_v35 }
 0x88f   :  { %v874_v37 = vmul.f32 0.5, %v873_v36 }
 0x891   :  { %v875_v39 = vsub.f32 1.5, %v874_v37 }
 0x893   :  { %v876_v42 = vmul.f32 %v1880_v29, %v875_v39 }
 0x895   :  { %v880_v44 = vsel %vm879_vm6, %v1880_v29, %v876_v42 }
 0x896   :  { %v891_v45 = vmul.f32 %v880_v44, %v857_v24 }
 0x898   :  { %v894_v1 = vmul.f32 %v893_v43, %v891_v45 }
 0x89a   :  { %v897_v3 = vadd.f32 %v896_v46, %v894_v1 }
 0x89c   :  { %1723 = vmatmul.msk.f32.vlgmr.msra.gmra.mxu3 %vm77_vm0, %v897_v3 }
 0x8ae   :  { %v866_v48 = vpop.xlane.xlu2 %865 }
 0x8af   :  { %v868_v49 = vmul.f32 %v866_v48, %v2022_v14 }
 0x8b1   :  { %v870_v50 = vadd.f32 1e-06, %v868_v49 }
 0x8b3   :  { %1881 = vrsqrt.f32 %v870_v50  ;;  %vm887_vm12 = vweird.f32 %v870_v50 }
 0x8b9   :  { %v1882_v51 = vpop.eup %1881 }
 0x8ba   :  { %v882_v6 = vmul.f32 %v1882_v51, %v870_v50  ;;  %vm888_vm7 = vweird.f32 %v1882_v51 }
 0x8bb   :  { %vm889_vm13 = vmor %vm887_vm12, %vm888_vm7 }
 0x8bc   :  { %v883_v52 = vmul.f32 %v1882_v51, %v882_v6 }
 0x8be   :  { %v884_v54 = vmul.f32 0.5, %v883_v52 }
 0x8c0   :  { %v885_v47 = vsub.f32 1.5, %v884_v54 }
 0x8c2   :  { %v886_v55 = vmul.f32 %v1882_v51, %v885_v47 }
 0x8c4   :  { %v890_v56 = vsel %vm889_vm13, %v1882_v51, %v886_v55 }
 0x8c5   :  { %v892_v57 = vmul.f32 %v890_v56, %v858_v4 }
 0x8c7   :  { %v895_v58 = vmul.f32 %v893_v43, %v892_v57 }
 0x8c9   :  { %v898_v59 = vadd.f32 %v896_v46, %v895_v58 }
 0x8cb   :  { %1724 = vmatmul.msk.f32.gmra.mxu3 %vm77_vm0, %v898_v59 }
 0x91f   :  { %v928_v7 = vpop.f32.mrf.mxu3 }
 0x920   :  { %v2335_v2 = vadd.f32 %v928_v7, %v904_v61 }
 0x922   :  { %940 = vrot.lane.b32.xlu2 %v2335_v2, %s1955_s18 }
 0x94e   :  { %v931_v8 = vpop.f32.mrf.mxu3 }
 0x94f   :  { %v2339_v9 = vadd.f32 %v931_v8, %v904_v61 }
 0x951   :  { %946 = vrot.lane.b32.xlu1 %v2339_v9, %s1957_s20  ;;  %942 = vrot.lane.b32.xlu0 %v2339_v9, %s1955_s18 }
 0x959   :  { %938 = vrot.lane.b32.xlu1 %v2339_v9, %s1954_s17  ;;  %944 = vrot.lane.b32.xlu0 %v2335_v2, %s1957_s20 }
 0x961   :  { %936 = vrot.lane.b32.xlu0 %v2335_v2, %s1954_s17 }
 0x97c   :  { %v2351_v63 = vpop.permute.xlu2 %940 }
 0x97d   :  { %1018 = vrot.lane.b32.xlu0 %v2351_v63, %s1956_s19 }
 0x9c3   :  { %v947_v5 = vpop.permute.xlu1 %946  ;;  %v943_v10 = vpop.permute.xlu0 %942 }
 0x9c4   :  { %1055 = vrot.lane.b32.xlu1 %v947_v5, %s1956_s19  ;;  %1020 = vrot.lane.b32.xlu2 %v943_v10, %s1956_s19  ;;  %v1813_v42 = vpack.i.bf16 %v2351_v63, %v943_v10 }
 0x9cb   :  { %v2357_v11 = vpop.permute.xlu1 %938  ;;  %v945_v13 = vpop.permute.xlu0 %944 }
 0x9cc   :  { %950 = vrot.lane.b32.xlu1 %v2339_v9, %s1956_s19  ;;  %1053 = vrot.lane.b32.xlu2 %v945_v13, %s1956_s19  ;;  %v1818_v39 = vpack.i.bf16 %v945_v13, %v947_v5 }
 0x9cd   :  { %985 = vrot.lane.b32.xlu0 %v2357_v11, %s1956_s19 }
 0x9d3   :  { %v2364_v15 = vpop.permute.xlu0 %936 }
 0x9d4   :  { %948 = vrot.lane.b32.xlu2 %v2335_v2, %s1956_s19  ;;  %983 = vrot.lane.b32.xlu1 %v2364_v15, %s1956_s19 }
 0x9ef   :  { %v1019_v18 = vpop.permute.xlu0 %1018 }
 0xa1e   :  { %v1021_v16 = vpop.permute.xlu2 %1020 }
 0xa1f   :  { %1733 = vmatpush.xpose.msk.msrb.mxu2 %vm187_vm8, %v1021_v16 }
 0xa23   :  { %1734 = vmatpush.xpose.msk.msrb.mxu2 %vm187_vm8, %v1019_v18 }
 0xa26   :  { %1735 = vmatmul.msk.f32.vlgmr.msrb.gmra.mxu2 %vm187_vm8, %v2351_v63  ;;  %v1054_v20 = vpop.permute.xlu2 %1053 }
 0xa2e   :  { %1736 = vmatmul.msk.f32.gmra.mxu2 %vm187_vm8, %v943_v10  ;;  %v949_v40 = vpop.permute.xlu2 %948 }
 0xa36   :  { %v1056_v19 = vpop.permute.xlu1 %1055 }
 0xa37   :  { %1737 = vmatpush.xpose.msk.msrb.mxu3 %vm187_vm8, %v1056_v19 }
 0xa3b   :  { %1738 = vmatpush.xpose.msk.msrb.mxu3 %vm187_vm8, %v1054_v20 }
 0xa3e   :  { %v951_v21 = vpop.permute.xlu1 %950  ;;  %1739 = vmatmul.msk.f32.vlgmr.msrb.gmra.mxu3 %vm187_vm8, %v945_v13 }
 0xa3f   :  { %v986_v23 = vpop.permute.xlu0 %985  ;;  %1725 = vmatpush.xpose.msk.msra.mxu0 %vm187_vm8, %v951_v21 }
 0xa40   :  { %1729 = vmatpush.xpose.msk.msra.mxu1 %vm187_vm8, %v986_v23  ;;  %v1823_v23 = vpack.i.bf16 %v2357_v11, %v2339_v9 }
 0xa43   :  { %1726 = vmatpush.xpose.msk.msra.mxu0 %vm187_vm8, %v949_v40 }
 0xa46   :  { %v984_v24 = vpop.permute.xlu1 %983  ;;  %1727 = vmatmul.msk.f32.vlgmr.msra.gmra.mxu0 %vm187_vm8, %v2335_v2  ;;  %1740 = vmatmul.msk.f32.gmra.mxu3 %vm187_vm8, %v947_v5 }
 0xa47   :  { %1730 = vmatpush.xpose.msk.msra.mxu1 %vm187_vm8, %v984_v24 }
 0xa4a   :  { %1731 = vmatmul.msk.f32.vlgmr.msra.gmra.mxu1 %vm187_vm8, %v2364_v15 }
 0xa4e   :  { %1728 = vmatmul.msk.f32.gmra.mxu0 %vm187_vm8, %v2339_v9 }
 0xa52   :  { %1732 = vmatmul.msk.f32.gmra.mxu1 %vm187_vm8, %v2357_v11 }
 0xaa9   :  { %v1047_v34 = vpop.f32.mrf.mxu2 }
 0xaaa   :  { %v1092_v62 = vsel %vm2124_vm9, %v1047_v34, -1e+30 }
 0xaab   :  { %v1108_v35 = vsel %vm336_vm10, %v1092_v62, -inf }
 0xab1   :  { %v1050_v49 = vpop.f32.mrf.mxu2 }
 0xab2   :  { %v1093_v6 = vsel %vm2131_vm11, %v1050_v49, -1e+30  ;;  %v1752_v49 = vld [vmem:[%s2568_s3 + $0x38] sm:$0xff] }
 0xab3   :  { %v1111_v47 = vsel %vm336_vm10, %v1093_v6, -inf }
 0xac1   :  { %v1082_v28 = vpop.f32.mrf.mxu3 }
 0xac2   :  { %v1094_v33 = vsel %vm2124_vm9, %v1082_v28, -1e+30 }
 0xac3   :  { %v977_v41 = vpop.f32.mrf.mxu0  ;;  %v1114_v60 = vsel %vm336_vm10, %v1094_v33, -inf }
 0xac4   :  { %v1088_v25 = vsel %vm2124_vm9, %v977_v41, -1e+30 }
 0xac5   :  { %v1096_v26 = vsel %vm336_vm10, %v1088_v25, -inf }
 0xac6   :  { %1097 = vmax.xlane.f32.xlu0 %v1096_v26 }
 0xac7   :  { %v1012_v0 = vpop.f32.mrf.mxu1 }
 0xac8   :  { %v1090_v4 = vsel %vm2124_vm9, %v1012_v0, -1e+30 }
 0xac9   :  { %v1102_v53 = vsel %vm336_vm10, %v1090_v4, -inf  ;;  %v1085_v55 = vpop.f32.mrf.mxu3 }
 0xaca   :  { %1103 = vmax.xlane.f32.xlu2 %v1102_v53  ;;  %v1095_v61 = vsel %vm2131_vm11, %v1085_v55, -1e+30 }
 0xacb   :  { %v980_v30 = vpop.f32.mrf.mxu0  ;;  %v1117_v63 = vsel %vm336_vm10, %v1095_v61, -inf }
 0xacc   :  { %v2399_v31 = vsel %vm2131_vm11, %v980_v30, -1e+30 }
 0xacd   :  { %v1099_v32 = vsel %vm336_vm10, %v2399_v31, -inf }
 0xace   :  { %1100 = vmax.xlane.f32.xlu0 %v1099_v32 }
 0xacf   :  { %v1015_v29 = vpop.f32.mrf.mxu1 }
 0xad0   :  { %v1091_v36 = vsel %vm2131_vm11, %v1015_v29, -1e+30 }
 0xad1   :  { %v1105_v37 = vsel %vm336_vm10, %v1091_v36, -inf }
 0xad2   :  { %1115 = vmax.xlane.f32.xlu2 %v1114_v60 }
 0xad6   :  { %1109 = vmax.xlane.f32.xlu0 %v1108_v35 }
 0xada   :  { %1106 = vmax.xlane.f32.xlu2 %v1105_v37 }
 0xaea   :  { %1819 = vrot.lane.b32.xlu0 %v1818_v39, %s1958_s21 }
 0xaf2   :  { %1814 = vrot.lane.b32.xlu2 %v1813_v42, %s1958_s21 }
 0xb39   :  { %v1098_v22 = vpop.xlane.xlu0 %1097 }
 0xb3a   :  { %v1120_v43 = vsub.f32 %v1088_v25, %v1098_v22 }
 0xb3c   :  { %v1128_v44 = vmul.f32 1.442695, %v1120_v43 }
 0xb3d   :  { %v1104_v45 = vpop.xlane.xlu2 %1103 }
 0xb3e   :  { %1883 = vpow2.f32 %v1128_v44  ;;  %v1122_v52 = vsub.f32 %v1090_v4, %v1104_v45 }
 0xb40   :  { %v1132_v57 = vmul.f32 1.442695, %v1122_v52 }
 0xb41   :  { %v1101_v50 = vpop.xlane.xlu0 %1100 }
 0xb42   :  { %v1121_v28 = vsub.f32 %v2399_v31, %v1101_v50 }
 0xb44   :  { %v2415_v46 = vpop.eup %1883  ;;  %v1130_v30 = vmul.f32 1.442695, %v1121_v28 }
 0xb45   :  { %v1116_v1 = vpop.xlane.xlu2 %1115  ;;  %v1144_v3 = vsel %vm336_vm10, %v2415_v46, 0.0 }
 0xb46   :  { %v1126_v48 = vsub.f32 %v1094_v33, %v1116_v1  ;;  %1145 = vadd.xlane.f32.xlu1 %v1144_v3 }
 0xb48   :  { %v1140_v51 = vmul.f32 1.442695, %v1126_v48  ;;  %v1828_v48 = vpack.i.bf16 %v2364_v15, %v2335_v2 }
 0xb49   :  { %v1110_v58 = vpop.xlane.xlu0 %1109 }
 0xb4a   :  { %1885 = vpow2.f32 %v1140_v51  ;;  %v1124_v7 = vsub.f32 %v1092_v62, %v1110_v58  ;;  %v1751_v51 = vld [vmem:[%s2568_s3 + $0x30] sm:$0xff] }
 0xb4b   :  { %1887 = vpow2.f32 %v1132_v57 }
 0xb4c   :  { %v1136_v10 = vmul.f32 1.442695, %v1124_v7 }
 0xb4d   :  { %v1107_v54 = vpop.xlane.xlu2 %1106 }
 0xb4e   :  { %1112 = vmax.xlane.f32.xlu1 %v1111_v47  ;;  %1889 = vpow2.f32 %v1136_v10  ;;  %v1123_v24 = vsub.f32 %v1091_v36, %v1107_v54 }
 0xb50   :  { %v1886_v56 = vpop.eup %1885  ;;  %v1134_v41 = vmul.f32 1.442695, %v1123_v24 }
 0xb51   :  { %v1162_v59 = vsel %vm336_vm10, %v1886_v56, 0.0  ;;  %v2426_v16 = vpop.eup %1887 }
 0xb52   :  { %1163 = vadd.xlane.f32.xlu0 %v1162_v59  ;;  %v1150_v27 = vsel %vm336_vm10, %v2426_v16, 0.0  ;;  %1891 = vpow2.f32 %v1134_v41 }
 0xb54   :  { %v1890_v21 = vpop.eup %1889 }
 0xb55   :  { %v1815_v8 = vpop.permute.xlu2 %1814  ;;  %v1156_v40 = vsel %vm336_vm10, %v1890_v21, 0.0 }
 0xb56   :  { %v1816_v5 = vunpack.i.l.bf16 %v1815_v8  ;;  %1118 = vmax.xlane.f32.xlu1 %v1117_v63  ;;  %v1817_v13 = vunpack.i.h.bf16 %v1815_v8 }
 0xb58   :  { %1280 = vmatpush.msra.mxu2 %v1816_v5  ;;  %v2434_v25 = vpop.eup %1891 }
 0xb59   :  { %v1153_v26 = vsel %vm336_vm10, %v2434_v25, 0.0 }
 0xb5a   :  { %1281 = vmatpush.msra.mxu2 %v1817_v13 }
 0xb5c   :  { %v1820_v18 = vpop.permute.xlu0 %1819  ;;  %1408 = vmatpush.msrb.mxu2 %v1751_v51 }
 0xb5d   :  { %v1821_v19 = vunpack.i.l.bf16 %v1820_v18  ;;  %v1822_v20 = vunpack.i.h.bf16 %v1820_v18 }
 0xb5e   :  { %1151 = vadd.xlane.f32.xlu1 %v1150_v27 }
 0xb5f   :  { %1315 = vmatpush.msra.mxu3 %v1821_v19 }
 0xb61   :  { %1316 = vmatpush.msra.mxu3 %v1822_v20 }
 0xb63   :  { %1437 = vmatpush.msrb.mxu3 %v1752_v49 }
 0xb66   :  { %1157 = vadd.xlane.f32.xlu1 %v1156_v40  ;;  %1824 = vrot.lane.b32.xlu0 %v1823_v23, %s1958_s21 }
 0xb90   :  { %1154 = vadd.xlane.f32.xlu0 %v1153_v26 }
 0xbb9   :  { %v1146_v0 = vpop.xlane.xlu1 %1145 }
 0xbc1   :  { %v1113_v4 = vpop.xlane.xlu1 %1112 }
 0xbc2   :  { %v1125_v53 = vsub.f32 %v1093_v6, %v1113_v4 }
 0xbc4   :  { %v1138_v9 = vmul.f32 1.442695, %v1125_v53 }
 0xbc5   :  { %v1164_v11 = vpop.xlane.xlu0 %1163 }
 0xbc6   :  { %1893 = vpow2.f32 %v1138_v9 }
 0xbc7   :  { %1895 = vrcp.f32 %v1164_v11 }
 0xbc8   :  { %1897 = vpow2.f32 %v1130_v30  ;;  %v1459_v30 = vperm.slane %v2327_v38, 4 }
 0xbc9   :  { %v1119_v32 = vpop.xlane.xlu1 %1118 }
 0xbca   :  { %v1127_v33 = vsub.f32 %v1095_v61, %v1119_v32 }
 0xbcc   :  { %v1894_v34 = vpop.eup %1893  ;;  %v1142_v60 = vmul.f32 1.442695, %v1127_v33 }
 0xbcd   :  { %v1896_v62 = vpop.eup %1895  ;;  %v1159_v29 = vsel %vm336_vm10, %v1894_v34, 0.0 }
 0xbce   :  { %v1182_v35 = vmul.f32 %v1896_v62, %v1886_v56  ;;  %1899 = vpow2.f32 %v1142_v60  ;;  %1160 = vadd.xlane.f32.xlu1 %v1159_v29  ;;  %v1898_v31 = vpop.eup %1897 }
 0xbcf   :  { %v1147_v42 = vsel %vm336_vm10, %v1898_v31, 0.0 }
 0xbd0   :  { %1747 = vmatmul.msk.f32.vlgmr.msra.gmra.mxu3 %vm336_vm10, %v1182_v35 }
 0xbd1   :  { %v1152_v36 = vpop.xlane.xlu1 %1151 }
 0xbd4   :  { %v1900_v37 = vpop.eup %1899 }
 0xbd5   :  { %v1165_v39 = vsel %vm336_vm10, %v1900_v37, 0.0 }
 0xbd6   :  { %1166 = vadd.xlane.f32.xlu2 %v1165_v39  ;;  %1148 = vadd.xlane.f32.xlu1 %v1147_v42 }
 0xbd8   :  { %v1825_v22 = vpop.permute.xlu0 %1824 }
 0xbd9   :  { %v1827_v43 = vunpack.i.h.bf16 %v1825_v22  ;;  %v1826_v44 = vunpack.i.l.bf16 %v1825_v22  ;;  %v1158_v45 = vpop.xlane.xlu1 %1157 }
 0xbda   :  { %1901 = vrcp.f32 %v1158_v45 }
 0xbdb   :  { %1210 = vmatpush.msrb.mxu0 %v1826_v44  ;;  %1245 = vmatpush.msrb.mxu1 %v1827_v43 }
 0xbe0   :  { %v1902_v1 = vpop.eup %1901 }
 0xbe1   :  { %v1180_v3 = vmul.f32 %v1902_v1, %v1890_v21 }
 0xbe3   :  { %1745 = vmatmul.msk.f32.vlgmr.msra.gmra.mxu2 %vm336_vm10, %v1180_v3 }
 0xbef   :  { %1829 = vrot.lane.b32.xlu1 %v1828_v48, %s1958_s21 }
 0xc03   :  { %v1155_v56 = vpop.xlane.xlu0 %1154 }
 0xc41   :  { %v1161_v50 = vpop.xlane.xlu1 %1160 }
 0xc42   :  { %1903 = vrcp.f32 %v1161_v50 }
 0xc48   :  { %v1904_v6 = vpop.eup %1903 }
 0xc49   :  { %v1167_v52 = vpop.xlane.xlu2 %1166  ;;  %v1181_v54 = vmul.f32 %v1904_v6, %v1894_v34  ;;  %v1149_v47 = vpop.xlane.xlu1 %1148 }
 0xc4a   :  { %1905 = vrcp.f32 %v1167_v52 }
 0xc4b   :  { %1746 = vmatmul.msk.f32.gmra.mxu2 %vm336_vm10, %v1181_v54  ;;  %1907 = vrcp.f32 %v1146_v0 }
 0xc4c   :  { %1909 = vrcp.f32 %v1152_v36 }
 0xc4d   :  { %1911 = vrcp.f32 %v1155_v56  ;;  %v1762_v56 = vld [vmem:[%s2569_s4 + $0x28] sm:$0xff] }
 0xc4e   :  { %1913 = vrcp.f32 %v1149_v47  ;;  %v1764_v47 = vld [vmem:[%s2569_s4 + $0x38] sm:$0xff] }
 0xc50   :  { %v1906_v2 = vpop.eup %1905 }
 0xc51   :  { %v1183_v15 = vmul.f32 %v1906_v2, %v1900_v37  ;;  %v1908_v57 = vpop.eup %1907 }
 0xc52   :  { %v1910_v58 = vpop.eup %1909  ;;  %v1176_v8 = vmul.f32 %v1908_v57, %v2415_v46  ;;  %v1749_v46 = vld [vmem:[%s2568_s3 + $0x20] sm:$0xff] }
 0xc53   :  { %1748 = vmatmul.msk.f32.gmra.mxu3 %vm336_vm10, %v1183_v15  ;;  %v1318_v55 = vpop.f32.mrf.mxu3  ;;  %v1178_v63 = vmul.f32 %v1910_v58, %v2426_v16  ;;  %v1912_v10 = vpop.eup %1911  ;;  %v1750_v16 = vld [vmem:[%s2568_s3 + $0x28] sm:$0xff]  ;;  %v1761_v57 = vld [vmem:[%s2569_s4 + $0x20] sm:$0xff]  ;;  %s1668_s3 = sshll.u32 %s2572_s7, 4  ;;  %s1669_s3 = int_to_ptr.hbm [resolvable:$true] %s1668_s3 }
 0xc54   :  { %v1914_v13 = vpop.eup %1913  ;;  %v1179_v19 = vmul.f32 %v1912_v10, %v2434_v25 }
 0xc55   :  { %v1177_v18 = vmul.f32 %v1914_v13, %v1898_v31 }
 0xc5b   :  { %1759 = vmatmul.msk.f32.vlgmr.msrb.gmra.mxu3 %vm187_vm8, %v1318_v55  ;;  %v1763_v55 = vld [vmem:[%s2569_s4 + $0x30] sm:$0xff] }
 0xc61   :  { %v1830_v59 = vpop.permute.xlu1 %1829 }
 0xc62   :  { %v1832_v61 = vunpack.i.h.bf16 %v1830_v59  ;;  %v1831_v7 = vunpack.i.l.bf16 %v1830_v59 }
 0xc64   :  { %1211 = vmatpush.msrb.mxu0 %v1831_v7  ;;  %1246 = vmatpush.msrb.mxu1 %v1832_v61 }
 0xc65   :  { %1741 = vmatmul.msk.f32.vlgmr.msrb.gmra.mxu0 %vm336_vm10, %v1176_v8  ;;  %1743 = vmatmul.msk.f32.vlgmr.msrb.gmra.mxu1 %vm336_vm10, %v1178_v63 }
 0xc66   :  { %v1283_v5 = vpop.f32.mrf.mxu2  ;;  %1350 = vmatpush.msra.mxu0 %v1749_v46  ;;  %1379 = vmatpush.msra.mxu1 %v1750_v16 }
 0xc67   :  { %1757 = vmatmul.msk.f32.vlgmr.msrb.gmra.mxu2 %vm187_vm8, %v1283_v5 }
 0xc68   :  { %1538 = vmatpush.msrb.mxu0 %v1764_v47 }
 0xc6a   :  { %1539 = vmatpush.msrb.mxu0 %v1763_v55 }
 0xc6c   :  { %1540 = vmatpush.msrb.mxu0 %v1762_v56 }
 0xc6d   :  { %1742 = vmatmul.msk.f32.gmra.mxu0 %vm336_vm10, %v1177_v18  ;;  %1744 = vmatmul.msk.f32.gmra.mxu1 %vm336_vm10, %v1179_v19 }
 0xc6e   :  { %1541 = vmatpush.msrb.mxu0 %v1761_v57  ;;  %v1576_v57 = vperm.slane %v2327_v38, 5 }
 0xcce   :  { %v1286_v27 = vpop.f32.mrf.mxu2 }
 0xccf   :  { %1758 = vmatmul.msk.f32.gmra.mxu2 %vm187_vm8, %v1286_v27 }
 0xcd6   :  { %v1321_v20 = vpop.f32.mrf.mxu3 }
 0xcd7   :  { %1760 = vmatmul.msk.f32.gmra.mxu3 %vm187_vm8, %v1321_v20  ;;  %v1508_v20 = vperm.slane %v2327_v38, 2 }
 0xcde   :  { %v1439_v53 = vpop.f32.mrf.mxu3 }
 0xcdf   :  { %v1450_v32 = vsel %vm77_vm0, %v1439_v53, 0.0 }
 0xce2   :  { %v1213_v21 = vpop.f32.mrf.mxu0  ;;  %v1248_v23 = vpop.f32.mrf.mxu1 }
 0xce3   :  { %1753 = vmatmul.msk.f32.vlgmr.msra.gmra.mxu0 %vm187_vm8, %v1213_v21  ;;  %1755 = vmatmul.msk.f32.vlgmr.msra.gmra.mxu1 %vm187_vm8, %v1248_v23 }
 0xcea   :  { %v1216_v40 = vpop.f32.mrf.mxu0  ;;  %v1251_v24 = vpop.f32.mrf.mxu1 }
 0xceb   :  { %1754 = vmatmul.msk.f32.gmra.mxu0 %vm187_vm8, %v1216_v40  ;;  %1756 = vmatmul.msk.f32.gmra.mxu1 %vm187_vm8, %v1251_v24  ;;  %v1410_v41 = vpop.f32.mrf.mxu2  ;;  %v1511_v24 = vperm.slane %v2327_v38, 3 }
 0xcec   :  { %v1448_v9 = vsel %vm77_vm0, %v1410_v41, 0.0 }
 0xd52   :  { %v1413_v34 = vpop.f32.mrf.mxu2 }
 0xd53   :  { %v1455_v42 = vsel %vm77_vm0, %v1413_v34, 0.0  ;;  %v1771_v34 = vld [vmem:[%s2570_s5 + $0x60] sm:$0xff] }
 0xd5a   :  { %v1442_v31 = vpop.f32.mrf.mxu3 }
 0xd5b   :  { %v1457_v44 = vsel %vm77_vm0, %v1442_v31, 0.0 }
 0xd60   :  { %v1352_v25 = vpop.f32.mrf.mxu0  ;;  %v1381_v26 = vpop.f32.mrf.mxu1 }
 0xd61   :  { %v1445_v0 = vsel %vm77_vm0, %v1352_v25, 0.0  ;;  %v1446_v4 = vsel %vm77_vm0, %v1381_v26, 0.0 }
 0xd62   :  { %v1447_v28 = vadd.f32 %v1446_v4, %v1445_v0 }
 0xd64   :  { %v1449_v11 = vadd.f32 %v1448_v9, %v1447_v28 }
 0xd66   :  { %v1451_v33 = vadd.f32 %v1450_v32, %v1449_v11  ;;  %v1773_v32 = vld [vmem:[%s2570_s5 + $0x70] sm:$0xff] }
 0xd68   :  { %v1355_v60 = vpop.f32.mrf.mxu0  ;;  %v1384_v62 = vpop.f32.mrf.mxu1  ;;  %v1460_v29 = vadd.f32 %v1459_v30, %v1451_v33  ;;  %v1772_v33 = vld [vmem:[%s2570_s5 + $0x68] sm:$0xff] }
 0xd69   :  { %v1452_v35 = vsel %vm77_vm0, %v1355_v60, 0.0  ;;  %v1453_v36 = vsel %vm77_vm0, %v1384_v62, 0.0  ;;  %v1770_v60 = vld [vmem:[%s2570_s5 + $0x58] sm:$0xff]  ;;  %v1769_v62 = vld [vmem:[%s2570_s5 + $0x50] sm:$0xff] }
 0xd6a   :  { %v1454_v37 = vadd.f32 %v1453_v36, %v1452_v35  ;;  %v2484_v39 = vadd.f32 %v1460_v29, %v2296_v17  ;;  %v1768_v29 = vld [vmem:[%s2570_s5 + $0x48] sm:$0xff]  ;;  %v1767_v35 = vld [vmem:[%s2570_s5 + $0x40] sm:$0xff]  ;;  %v1519_v36 = vperm.slane %v2327_v38, 6 }
 0xd6c   :  { %v1456_v22 = vadd.f32 %v1455_v42, %v1454_v37  ;;  %v1464_v43 = vsel %vm77_vm0, %v2484_v39, 0.0 }
 0xd6d   :  { %1465 = vadd.xlane.f32.xlu1 %v1464_v43 }
 0xd6e   :  { %v1458_v45 = vadd.f32 %v1457_v44, %v1456_v22 }
 0xd70   :  { %v1461_v1 = vadd.f32 %v1459_v30, %v1458_v45  ;;  %v1774_v30 = vld [vmem:[%s2570_s5 + $0x78] sm:$0xff] }
 0xd71   :  { %1591 = vmatpush.msrb.mxu1 %v1774_v30 }
 0xd72   :  { %v2491_v3 = vadd.f32 %v1461_v1, %v2301_v12 }
 0xd73   :  { %1592 = vmatpush.msrb.mxu1 %v1773_v32 }
 0xd74   :  { %v1467_v48 = vsel %vm77_vm0, %v2491_v3, 0.0 }
 0xd75   :  { %1468 = vadd.xlane.f32.xlu2 %v1467_v48  ;;  %1593 = vmatpush.msrb.mxu1 %v1772_v33 }
 0xd77   :  { %1594 = vmatpush.msrb.mxu1 %v1771_v34 }
 0xd79   :  { %1595 = vmatpush.msrb.mxu1 %v1770_v60 }
 0xd7b   :  { %1596 = vmatpush.msrb.mxu1 %v1769_v62 }
 0xd7d   :  { %1597 = vmatpush.msrb.mxu1 %v1768_v29 }
 0xd7f   :  { %1598 = vmatpush.msrb.mxu1 %v1767_v35 }
 0xde0   :  { %v1466_v17 = vpop.xlane.xlu1 %1465 }
 0xde1   :  { %v1470_v49 = vmul.f32 %v1466_v17, %v2022_v14 }
 0xde3   :  { %v1472_v50 = vsub.f32 %v2484_v39, %v1470_v49 }
 0xde5   :  { %v1474_v51 = vmul.f32 %v1472_v50, %v1472_v50 }
 0xde7   :  { %v1476_v6 = vsel %vm77_vm0, %v1474_v51, 0.0 }
 0xde8   :  { %1477 = vadd.xlane.f32.xlu2 %v1476_v6  ;;  %v1469_v52 = vpop.xlane.xlu2 %1468 }
 0xde9   :  { %v1471_v54 = vmul.f32 %v1469_v52, %v2022_v14 }
 0xdeb   :  { %v1473_v2 = vsub.f32 %v2491_v3, %v1471_v54 }
 0xded   :  { %v1475_v12 = vmul.f32 %v1473_v2, %v1473_v2 }
 0xdef   :  { %v1479_v15 = vsel %vm77_vm0, %v1475_v12, 0.0 }
 0xdf0   :  { %1480 = vadd.xlane.f32.xlu0 %v1479_v15 }
 0xe5b   :  { %v1478_v58 = vpop.xlane.xlu2 %1477 }
 0xe5c   :  { %v1482_v59 = vmul.f32 %v1478_v58, %v2022_v14 }
 0xe5e   :  { %v1484_v61 = vadd.f32 1e-06, %v1482_v59 }
 0xe60   :  { %1915 = vrsqrt.f32 %v1484_v61  ;;  %vm1492_vm9 = vweird.f32 %v1484_v61 }
 0xe63   :  { %v1481_v7 = vpop.xlane.xlu0 %1480 }
 0xe64   :  { %v1483_v8 = vmul.f32 %v1481_v7, %v2022_v14 }
 0xe66   :  { %v1916_v63 = vpop.eup %1915  ;;  %v1485_v5 = vadd.f32 1e-06, %v1483_v8 }
 0xe67   :  { %v1487_v10 = vmul.f32 %v1916_v63, %v1484_v61  ;;  %vm1493_vm8 = vweird.f32 %v1916_v63 }
 0xe68   :  { %1917 = vrsqrt.f32 %v1485_v5  ;;  %vm1494_vm10 = vmor %vm1492_vm9, %vm1493_vm8  ;;  %vm1502_vm14 = vweird.f32 %v1485_v5 }
 0xe69   :  { %v1488_v13 = vmul.f32 %v1916_v63, %v1487_v10 }
 0xe6b   :  { %v1489_v18 = vmul.f32 0.5, %v1488_v13 }
 0xe6d   :  { %v1490_v19 = vsub.f32 1.5, %v1489_v18 }
 0xe6e   :  { %v1918_v46 = vpop.eup %1917 }
 0xe6f   :  { %v1491_v16 = vmul.f32 %v1916_v63, %v1490_v19  ;;  %v1497_v27 = vmul.f32 %v1918_v46, %v1485_v5  ;;  %vm1503_vm11 = vweird.f32 %v1918_v46 }
 0xe70   :  { %vm1504_vm15 = vmor %vm1502_vm14, %vm1503_vm11 }
 0xe71   :  { %v1495_v21 = vsel %vm1494_vm10, %v1916_v63, %v1491_v16  ;;  %v1498_v23 = vmul.f32 %v1918_v46, %v1497_v27 }
 0xe72   :  { %v1506_v40 = vmul.f32 %v1495_v21, %v1472_v50 }
 0xe73   :  { %v1499_v41 = vmul.f32 0.5, %v1498_v23 }
 0xe74   :  { %v1509_v25 = vmul.f32 %v1508_v20, %v1506_v40 }
 0xe75   :  { %v1500_v26 = vsub.f32 1.5, %v1499_v41 }
 0xe76   :  { %v1512_v0 = vadd.f32 %v1511_v24, %v1509_v25 }
 0xe77   :  { %v1501_v4 = vmul.f32 %v1918_v46, %v1500_v26 }
 0xe78   :  { %1765 = vmatmul.msk.f32.vlgmr.msrb.gmra.mxu0 %vm77_vm0, %v1512_v0 }
 0xe79   :  { %v1505_v53 = vsel %vm1504_vm15, %v1918_v46, %v1501_v4 }
 0xe7a   :  { %v1507_v28 = vmul.f32 %v1505_v53, %v1473_v2 }
 0xe7c   :  { %v1510_v9 = vmul.f32 %v1508_v20, %v1507_v28  ;;  %v1777_v28 = vld [vmem:[%s2571_s6 + $0x10] sm:$0xff]  ;;  %s1959_s6 = smov [#allocation2]  }
 0xe7d   :  { %v1654_v33 = vperm.slane %v1777_v28, 0  ;;  %v1657_v62 = vperm.slane %v1777_v28, 1  ;;  %s1666_s21 = sshll.u32 %s1959_s6, 4  ;;  %s1667_s21 = int_to_ptr.vmem [resolvable:$true] %s1666_s21 }
 0xe7e   :  { %v1513_v11 = vadd.f32 %v1511_v24, %v1510_v9 }
 0xe80   :  { %1766 = vmatmul.msk.f32.gmra.mxu0 %vm77_vm0, %v1513_v11 }
 0xef5   :  { %v1543_v31 = vpop.f32.mrf.mxu0 }
 0xef6   :  { %v1544_v37 = vadd.f32 %v1543_v31, %v1519_v36 }
 0xef8   :  { %v1549_v42 = vmul.f32 %v1544_v37, %v1544_v37 }
 0xefa   :  { %v1551_v22 = vmul.f32 %v1549_v42, %v1544_v37 }
 0xefc   :  { %v1553_v43 = vmul.f32 0.044715, %v1551_v22 }
 0xefd   :  { %v1546_v44 = vpop.f32.mrf.mxu0 }
 0xefe   :  { %v1555_v45 = vadd.f32 %v1553_v43, %v1544_v37  ;;  %v1547_v1 = vadd.f32 %v1546_v44, %v1519_v36 }
 0xf00   :  { %v1557_v48 = vmul.f32 0.7978846, %v1555_v45  ;;  %v1550_v17 = vmul.f32 %v1547_v1, %v1547_v1 }
 0xf02   :  { %1919 = vtanh.f32 %v1557_v48  ;;  %v1552_v49 = vmul.f32 %v1550_v17, %v1547_v1 }
 0xf04   :  { %v1554_v50 = vmul.f32 0.044715, %v1552_v49 }
 0xf06   :  { %v1556_v51 = vadd.f32 %v1554_v50, %v1547_v1 }
 0xf08   :  { %v1920_v6 = vpop.eup %1919  ;;  %v1558_v52 = vmul.f32 0.7978846, %v1556_v51 }
 0xf09   :  { %v1561_v54 = vadd.f32 1.0, %v1920_v6 }
 0xf0a   :  { %1921 = vtanh.f32 %v1558_v52 }
 0xf0b   :  { %v1563_v2 = vmul.f32 0.5, %v1561_v54 }
 0xf0d   :  { %v1565_v12 = vmul.f32 %v1563_v2, %v1544_v37 }
 0xf0f   :  { %1775 = vmatmul.msk.f32.vlgmr.msrb.gmra.mxu1 %vm815_vm3, %v1565_v12 }
 0xf10   :  { %v1922_v15 = vpop.eup %1921 }
 0xf11   :  { %v1562_v47 = vadd.f32 1.0, %v1922_v15 }
 0xf13   :  { %v1564_v55 = vmul.f32 0.5, %v1562_v47 }
 0xf15   :  { %v1566_v56 = vmul.f32 %v1564_v55, %v1547_v1 }
 0xf17   :  { %1776 = vmatmul.msk.f32.gmra.mxu1 %vm815_vm3, %v1566_v56 }
 0xf8c   :  { %v1600_v58 = vpop.f32.mrf.mxu1 }
 0xf8d   :  { %v1601_v59 = vadd.f32 %v1600_v58, %v1576_v57 }
 0xf8f   :  { %v1606_v61 = vadd.f32 %v1601_v59, %v2484_v39 }
 0xf91   :  { %v1610_v7 = vsel %vm77_vm0, %v1606_v61, 0.0 }
 0xf92   :  { %1611 = vadd.xlane.f32.xlu2 %v1610_v7 }
 0xf94   :  { %v1603_v8 = vpop.f32.mrf.mxu1 }
 0xf95   :  { %v1604_v63 = vadd.f32 %v1603_v8, %v1576_v57 }
 0xf97   :  { %v1607_v5 = vadd.f32 %v1604_v63, %v2491_v3 }
 0xf99   :  { %v1613_v10 = vsel %vm77_vm0, %v1607_v5, 0.0 }
 0xf9a   :  { %1614 = vadd.xlane.f32.xlu0 %v1613_v10 }
0x1005   :  { %v1612_v13 = vpop.xlane.xlu2 %1611 }
0x1006   :  { %v1616_v18 = vmul.f32 %v1612_v13, %v2022_v14 }
0x1008   :  { %v1618_v19 = vsub.f32 %v1606_v61, %v1616_v18 }
0x100a   :  { %v1620_v46 = vmul.f32 %v1618_v19, %v1618_v19 }
0x100c   :  { %v1622_v38 = vsel %vm77_vm0, %v1620_v46, 0.0 }
0x100d   :  { %v1615_v16 = vpop.xlane.xlu0 %1614  ;;  %1623 = vadd.xlane.f32.xlu2 %v1622_v38 }
0x100e   :  { %v1617_v39 = vmul.f32 %v1615_v16, %v2022_v14 }
0x1010   :  { %v1619_v27 = vsub.f32 %v1607_v5, %v1617_v39 }
0x1012   :  { %v1621_v20 = vmul.f32 %v1619_v27, %v1619_v27 }
0x1014   :  { %v1625_v21 = vsel %vm77_vm0, %v1621_v20, 0.0 }
0x1015   :  { %1626 = vadd.xlane.f32.xlu0 %v1625_v21 }
0x1080   :  { %v1624_v3 = vpop.xlane.xlu2 %1623 }
0x1081   :  { %v1628_v23 = vmul.f32 %v1624_v3, %v2022_v14 }
0x1083   :  { %v1630_v40 = vadd.f32 1e-06, %v1628_v23 }
0x1085   :  { %1923 = vrsqrt.f32 %v1630_v40  ;;  %vm1638_vm2 = vweird.f32 %v1630_v40 }
0x1088   :  { %v1627_v24 = vpop.xlane.xlu0 %1626 }
0x1089   :  { %v1629_v41 = vmul.f32 %v1627_v24, %v2022_v14 }
0x108b   :  { %v1924_v25 = vpop.eup %1923  ;;  %v1631_v26 = vadd.f32 1e-06, %v1629_v41 }
0x108c   :  { %v1633_v0 = vmul.f32 %v1924_v25, %v1630_v40  ;;  %vm1639_vm1 = vweird.f32 %v1924_v25 }
0x108d   :  { %1925 = vrsqrt.f32 %v1631_v26  ;;  %vm1640_vm3 = vmor %vm1638_vm2, %vm1639_vm1  ;;  %vm1648_vm5 = vweird.f32 %v1631_v26 }
0x108e   :  { %v1634_v4 = vmul.f32 %v1924_v25, %v1633_v0 }
0x1090   :  { %v1635_v53 = vmul.f32 0.5, %v1634_v4 }
0x1092   :  { %v1636_v9 = vsub.f32 1.5, %v1635_v53 }
0x1093   :  { %v1926_v11 = vpop.eup %1925 }
0x1094   :  { %v1637_v30 = vmul.f32 %v1924_v25, %v1636_v9  ;;  %v1643_v32 = vmul.f32 %v1926_v11, %v1631_v26  ;;  %vm1649_vm4 = vweird.f32 %v1926_v11 }
0x1095   :  { %vm1650_vm6 = vmor %vm1648_vm5, %vm1649_vm4 }
0x1096   :  { %v1641_v34 = vsel %vm1640_vm3, %v1924_v25, %v1637_v30  ;;  %v1644_v14 = vmul.f32 %v1926_v11, %v1643_v32 }
0x1097   :  { %v1652_v60 = vmul.f32 %v1641_v34, %v1618_v19 }
0x1098   :  { %v1645_v29 = vmul.f32 0.5, %v1644_v14 }
0x1099   :  { %v1655_v35 = vmul.f32 %v1654_v33, %v1652_v60 }
0x109a   :  { %v1646_v36 = vsub.f32 1.5, %v1645_v29 }
0x109b   :  { %v1658_v31 = vadd.f32 %v1657_v62, %v1655_v35 }
0x109c   :  { %v1647_v37 = vmul.f32 %v1926_v11, %v1646_v36 }
0x109d   :  { %1660 = vst.msk [vmem:[#allocation2] sm:$0xff] %vm77_vm0, %v1658_v31 }
0x109e   :  { %v1651_v42 = vsel %vm1650_vm6, %v1926_v11, %v1647_v37 }
0x109f   :  { %v1653_v22 = vmul.f32 %v1651_v42, %v1619_v27 }
0x10a1   :  { %v1656_v43 = vmul.f32 %v1654_v33, %v1653_v22 }
0x10a3   :  { %v1659_v44 = vadd.f32 %v1657_v62, %v1656_v43 }
0x10a5   :  { %1661 = vst.msk [vmem:[#allocation2 + $0x8] sm:$0xff] %vm77_vm0, %v1659_v44 }
0x10a6   :  { %1674 = dma.vmem_to_hbm [thread:$0]  %s1667_s21, 256, %s1669_s3, [#allocation3], %s1960_s26, %s1960_s26, %s1961_s27  }
0x10a7   :  { %1951 = dma.done.wait [#allocation3], 256  }
0x10a8   :  { %1952 = vsyncadd [#allocation3], 4294967040 }
0x10a9   :  { %1679 = vsyncpa [#allocation3], 1 }

</bundles_post_ra>
